<compile_context>
chip_gen: v7x
topology: tpu7x:2x2x1
jax: 0.10.0
libtpu: 0.0.40
codegen_flags: <defaults>
</compile_context>

<pallas_src>
import jax
import jax.numpy as jnp
from jax.experimental import pallas as pl
from jax.experimental.pallas import tpu as pltpu

H = 256  # hidden width of every layer


def _make_mlp_kernel(relu_in_bf16):
    """Build the fused kernel; `relu_in_bf16` folds the bf16 downcast before ReLU
    (profitable on v6e/v7x bf16 VALUs; v5e keeps the f32 ReLU path)."""

    def _hidden_epilogue(h_f32):
        if relu_in_bf16:
            # bias already added in f32; max(.,0) commutes with the downcast.
            return jnp.maximum(h_f32.astype(jnp.bfloat16), 0.0)
        return jnp.maximum(h_f32, 0.0).astype(jnp.bfloat16)

    def mlp_kernel(x_ref,
                   w1_ref, b1_ref,
                   w2_ref, b2_ref,
                   w3_ref, b3_ref,
                   w4_ref, b4_ref,
                   w5_ref, b5_ref,
                   o_ref):
        # Layer 1: bf16 inputs on the MXU, f32 accumulation, f32 bias.
        h = jnp.dot(x_ref[...], w1_ref[...],
                    preferred_element_type=jnp.float32) + b1_ref[...]
        h = _hidden_epilogue(h)

        # Layers 2-4 (256 -> 256), bf16 activations into each MXU pass.
        h = jnp.dot(h, w2_ref[...],
                    preferred_element_type=jnp.float32) + b2_ref[...]
        h = _hidden_epilogue(h)
        h = jnp.dot(h, w3_ref[...],
                    preferred_element_type=jnp.float32) + b3_ref[...]
        h = _hidden_epilogue(h)
        h = jnp.dot(h, w4_ref[...],
                    preferred_element_type=jnp.float32) + b4_ref[...]
        h = _hidden_epilogue(h)

        # Layer 5 (256 -> 1), lane-dense along the batch axis, no XLU transpose:
        #   contract w5 (8, H) with h (tile_b, H) over H -> (8, tile_b).
        # Only row 0 of w5_ref is real (rows 1..7 are zero sublane padding);
        # rows 1..7 of out8 hold b5-valued garbage and are never stored.
        out8 = jax.lax.dot_general(
            w5_ref[...], h,
            dimension_numbers=(((1,), (1,)), ((), ())),
            preferred_element_type=jnp.float32) + b5_ref[...]
        o_ref[...] = out8[0:1, :][None]

    return mlp_kernel


def _round_up(n, m):
    return ((n + m - 1) // m) * m


def _tpu_generation():
    """Best-effort chip-generation sniff ('v5' / 'v6' / 'v7'), None if unknown."""
    try:
        kind = jax.devices()[0].device_kind.lower()
    except Exception:  # pragma: no cover - perf heuristic only
        return None
    for gen in ("v7", "v6", "v5"):
        if gen in kind:
            return gen
    return None


def mlp_forward(x, params, *, tile_b=512):
    """x: (B, D) float32. params: f32 dict of (in,out) weights / (1,out) biases."""
    B, D = x.shape
    LANE = 128

    gen = _tpu_generation()
    two_tensorcores = (gen == "v7")        # v5e / v6e have a single TC per chip
    relu_in_bf16 = (gen != "v5")           # v5e VALU has no bf16 path

    # ---- tile sizing (tile_b always a multiple of 128) -----------------------
    D_pad = _round_up(max(D, LANE), LANE)
    B_align = _round_up(B, LANE)
    tile_b = max(LANE, (tile_b // LANE) * LANE)
    tile_b = min(tile_b, B_align)
    if two_tensorcores and B_align // tile_b < 2 and tile_b >= 2 * LANE:
        # Largest 128-multiple tile that yields an even (=2) split so both
        # TensorCores get work; single-TC parts keep the one big tile.
        tile_b = _round_up(B_align // 2, LANE)
    B_pad = _round_up(B_align, tile_b)
    num_tiles = B_pad // tile_b

    # ---- wrapper-side padding / dtype plumbing -------------------------------
    x_p = jnp.pad(x, ((0, B_pad - B), (0, D_pad - D))).astype(jnp.bfloat16)
    w1 = jnp.pad(params["w1"], ((0, D_pad - D), (0, 0))).astype(jnp.bfloat16)
    b1 = params["b1"]
    w2, b2 = params["w2"].astype(jnp.bfloat16), params["b2"]
    w3, b3 = params["w3"].astype(jnp.bfloat16), params["b3"]
    w4, b4 = params["w4"].astype(jnp.bfloat16), params["b4"]
    # w5 as a (1, H) row zero-padded to 8 rows (sublane-aligned lhs), bf16.
    w5 = jnp.pad(params["w5"].T, ((0, 7), (0, 0))).astype(jnp.bfloat16)
    b5 = params["b5"].reshape(1, 1)

    def wfull(shape):
        # Whole-array block with a constant index -> fetched once, stays
        # VMEM-resident across all grid steps (no per-step weight DMA).
        n = len(shape)
        return pl.BlockSpec(shape, lambda i: (0,) * n)

    flops = 2 * B_pad * (D_pad * H + 3 * H * H + 8 * H)
    bytes_accessed = int(
        x_p.size * 2
        + (w1.size + w2.size + w3.size + w4.size + w5.size) * 2
        + (b1.size + b2.size + b3.size + b4.size + b5.size) * 4
        + num_tiles * tile_b * 4)

    out = pl.pallas_call(
        _make_mlp_kernel(relu_in_bf16),
        out_shape=jax.ShapeDtypeStruct((num_tiles, 1, tile_b), jnp.float32),
        grid_spec=pltpu.PrefetchScalarGridSpec(
            num_scalar_prefetch=0,
            grid=(num_tiles,),
            in_specs=[
                pl.BlockSpec((tile_b, D_pad), lambda i: (i, 0)),   # x tile
                wfull((D_pad, H)), wfull((1, H)),                  # layer 1
                wfull((H, H)), wfull((1, H)),                      # layer 2
                wfull((H, H)), wfull((1, H)),                      # layer 3
                wfull((H, H)), wfull((1, H)),                      # layer 4
                wfull((8, H)), wfull((1, 1)),                      # layer 5
            ],
            out_specs=pl.BlockSpec((1, 1, tile_b), lambda i: (i, 0, 0)),
        ),
        compiler_params=pltpu.CompilerParams(
            dimension_semantics=("parallel",)),
        cost_estimate=pl.CostEstimate(
            flops=flops, transcendentals=0, bytes_accessed=bytes_accessed),
    )(x_p, w1, b1, w2, b2, w3, b3, w4, b4, w5, b5)

    # Lane-dense slab (num_tiles, 1, tile_b): flatten back to (B, 1).
    return out[:, 0, :].reshape(B_pad, 1)[:B]


def init_params(key, input_dim):
    """Deterministic init mirroring nn.Linear shapes (stored transposed as (in,out))."""
    dims = [(input_dim, H), (H, H), (H, H), (H, H), (H, 1)]
    params = {}
    for idx, (d_in, d_out) in enumerate(dims, start=1):
        key, kw, kb = jax.random.split(key, 3)
        bound = 1.0 / jnp.sqrt(d_in)
        params[f"w{idx}"] = jax.random.uniform(
            kw, (d_in, d_out), jnp.float32, -bound, bound)
        params[f"b{idx}"] = jax.random.uniform(
            kb, (1, d_out), jnp.float32, -bound, bound)
    return params


def reference_forward(x, params):
    """Pure-JAX reference mirroring the kernel's precision (bf16 matmul inputs
    everywhere, f32 accumulation / bias / ReLU)."""
    h = x.astype(jnp.bfloat16)
    for idx in range(1, 5):
        w = params[f"w{idx}"].astype(jnp.bfloat16)
        h = jnp.dot(h, w, preferred_element_type=jnp.float32) + params[f"b{idx}"]
        h = jnp.maximum(h, 0.0).astype(jnp.bfloat16)
    return jnp.dot(h, params["w5"].astype(jnp.bfloat16),
                   preferred_element_type=jnp.float32) + params["b5"]


if __name__ == "__main__":
    key = jax.random.PRNGKey(0)
    k_x, k_p = jax.random.split(key)

    input_dim = 32
    batch = 16

    x = jax.random.normal(k_x, (batch, input_dim), jnp.float32)
    params = init_params(k_p, input_dim)

    out = mlp_forward(x, params)
    out = jax.block_until_ready(out)

    ref = reference_forward(x, params)
    assert out.shape == (batch, 1)
    assert jnp.allclose(out, ref, atol=2e-2, rtol=2e-2), "mismatch vs reference"

    print("KERNEL_OK")
</pallas_src>

<mosaic_0001>
module attributes {stable_mosaic.version = 11 : i64} {
  func.func @mlp_kernel(%arg0: i32, %arg1: memref<128x128xbf16, #tpu.memory_space<vmem>>, %arg2: memref<128x256xbf16, #tpu.memory_space<vmem>>, %arg3: memref<1x256xf32, #tpu.memory_space<vmem>>, %arg4: memref<256x256xbf16, #tpu.memory_space<vmem>>, %arg5: memref<1x256xf32, #tpu.memory_space<vmem>>, %arg6: memref<256x256xbf16, #tpu.memory_space<vmem>>, %arg7: memref<1x256xf32, #tpu.memory_space<vmem>>, %arg8: memref<256x256xbf16, #tpu.memory_space<vmem>>, %arg9: memref<1x256xf32, #tpu.memory_space<vmem>>, %arg10: memref<8x256xbf16, #tpu.memory_space<vmem>>, %arg11: memref<1x1xf32, #tpu.memory_space<vmem>>, %arg12: memref<1x1x128xf32, #tpu.memory_space<vmem>>) attributes {dimension_semantics = [#tpu.dimension_semantics<parallel>], iteration_bounds = array<i64: 1>, scalar_prefetch = 0 : i64, scratch_operands = 0 : i64, tpu.core_type = #tpu.core_type<tc>, window_params = [{transform_indices = @transform_0, window_bounds = array<i64: 128, 128>}, {pipeline_mode = #tpu.pipeline_mode<synchronous>, transform_indices = @transform_1, window_bounds = array<i64: 128, 256>}, {pipeline_mode = #tpu.pipeline_mode<synchronous>, transform_indices = @transform_2, window_bounds = array<i64: 1, 256>}, {pipeline_mode = #tpu.pipeline_mode<synchronous>, transform_indices = @transform_3, window_bounds = array<i64: 256, 256>}, {pipeline_mode = #tpu.pipeline_mode<synchronous>, transform_indices = @transform_4, window_bounds = array<i64: 1, 256>}, {pipeline_mode = #tpu.pipeline_mode<synchronous>, transform_indices = @transform_5, window_bounds = array<i64: 256, 256>}, {pipeline_mode = #tpu.pipeline_mode<synchronous>, transform_indices = @transform_6, window_bounds = array<i64: 1, 256>}, {pipeline_mode = #tpu.pipeline_mode<synchronous>, transform_indices = @transform_7, window_bounds = array<i64: 256, 256>}, {pipeline_mode = #tpu.pipeline_mode<synchronous>, transform_indices = @transform_8, window_bounds = array<i64: 1, 256>}, {pipeline_mode = #tpu.pipeline_mode<synchronous>, transform_indices = @transform_9, window_bounds = array<i64: 8, 256>}, {pipeline_mode = #tpu.pipeline_mode<synchronous>, transform_indices = @transform_10, window_bounds = array<i64: 1, 1>}, {transform_indices = @transform_11, window_bounds = array<i64: 1, 1, 128>}]} {
    %c0 = arith.constant 0 : index
    %c0_0 = arith.constant 0 : index
    %0 = vector.load %arg1[%c0, %c0_0] : memref<128x128xbf16, #tpu.memory_space<vmem>>, vector<128x128xbf16>
    %c0_1 = arith.constant 0 : index
    %c0_2 = arith.constant 0 : index
    %1 = vector.load %arg2[%c0_1, %c0_2] : memref<128x256xbf16, #tpu.memory_space<vmem>>, vector<128x256xbf16>
    %cst = arith.constant dense<0.000000e+00> : vector<128x256xf32>
    %2 = tpu.matmul %0, %1, %cst {dimension_numbers = #tpu.dot_dimension_numbers<[1], [0], [0], [1], [0, 0, 1, 1], [], []>} : vector<128x128xbf16>, vector<128x256xbf16>, vector<128x256xf32> -> vector<128x256xf32>
    %c0_3 = arith.constant 0 : index
    %c0_4 = arith.constant 0 : index
    %3 = vector.load %arg3[%c0_3, %c0_4] : memref<1x256xf32, #tpu.memory_space<vmem>>, vector<1x256xf32>
    %4 = vector.broadcast %3 : vector<1x256xf32> to vector<128x256xf32>
    %5 = arith.addf %2, %4 : vector<128x256xf32>
    %6 = arith.truncf %5 : vector<128x256xf32> to vector<128x256xbf16>
    %cst_5 = arith.constant 0.000000e+00 : bf16
    %7 = vector.broadcast %cst_5 : bf16 to vector<128x256xbf16>
    %8 = arith.maximumf %6, %7 : vector<128x256xbf16>
    %c0_6 = arith.constant 0 : index
    %c0_7 = arith.constant 0 : index
    %9 = vector.load %arg4[%c0_6, %c0_7] : memref<256x256xbf16, #tpu.memory_space<vmem>>, vector<256x256xbf16>
    %cst_8 = arith.constant dense<0.000000e+00> : vector<128x256xf32>
    %10 = tpu.matmul %8, %9, %cst_8 {dimension_numbers = #tpu.dot_dimension_numbers<[1], [0], [0], [1], [0, 0, 1, 1], [], []>} : vector<128x256xbf16>, vector<256x256xbf16>, vector<128x256xf32> -> vector<128x256xf32>
    %c0_9 = arith.constant 0 : index
    %c0_10 = arith.constant 0 : index
    %11 = vector.load %arg5[%c0_9, %c0_10] : memref<1x256xf32, #tpu.memory_space<vmem>>, vector<1x256xf32>
    %12 = vector.broadcast %11 : vector<1x256xf32> to vector<128x256xf32>
    %13 = arith.addf %10, %12 : vector<128x256xf32>
    %14 = arith.truncf %13 : vector<128x256xf32> to vector<128x256xbf16>
    %cst_11 = arith.constant 0.000000e+00 : bf16
    %15 = vector.broadcast %cst_11 : bf16 to vector<128x256xbf16>
    %16 = arith.maximumf %14, %15 : vector<128x256xbf16>
    %c0_12 = arith.constant 0 : index
    %c0_13 = arith.constant 0 : index
    %17 = vector.load %arg6[%c0_12, %c0_13] : memref<256x256xbf16, #tpu.memory_space<vmem>>, vector<256x256xbf16>
    %cst_14 = arith.constant dense<0.000000e+00> : vector<128x256xf32>
    %18 = tpu.matmul %16, %17, %cst_14 {dimension_numbers = #tpu.dot_dimension_numbers<[1], [0], [0], [1], [0, 0, 1, 1], [], []>} : vector<128x256xbf16>, vector<256x256xbf16>, vector<128x256xf32> -> vector<128x256xf32>
    %c0_15 = arith.constant 0 : index
    %c0_16 = arith.constant 0 : index
    %19 = vector.load %arg7[%c0_15, %c0_16] : memref<1x256xf32, #tpu.memory_space<vmem>>, vector<1x256xf32>
    %20 = vector.broadcast %19 : vector<1x256xf32> to vector<128x256xf32>
    %21 = arith.addf %18, %20 : vector<128x256xf32>
    %22 = arith.truncf %21 : vector<128x256xf32> to vector<128x256xbf16>
    %cst_17 = arith.constant 0.000000e+00 : bf16
    %23 = vector.broadcast %cst_17 : bf16 to vector<128x256xbf16>
    %24 = arith.maximumf %22, %23 : vector<128x256xbf16>
    %c0_18 = arith.constant 0 : index
    %c0_19 = arith.constant 0 : index
    %25 = vector.load %arg8[%c0_18, %c0_19] : memref<256x256xbf16, #tpu.memory_space<vmem>>, vector<256x256xbf16>
    %cst_20 = arith.constant dense<0.000000e+00> : vector<128x256xf32>
    %26 = tpu.matmul %24, %25, %cst_20 {dimension_numbers = #tpu.dot_dimension_numbers<[1], [0], [0], [1], [0, 0, 1, 1], [], []>} : vector<128x256xbf16>, vector<256x256xbf16>, vector<128x256xf32> -> vector<128x256xf32>
    %c0_21 = arith.constant 0 : index
    %c0_22 = arith.constant 0 : index
    %27 = vector.load %arg9[%c0_21, %c0_22] : memref<1x256xf32, #tpu.memory_space<vmem>>, vector<1x256xf32>
    %28 = vector.broadcast %27 : vector<1x256xf32> to vector<128x256xf32>
    %29 = arith.addf %26, %28 : vector<128x256xf32>
    %30 = arith.truncf %29 : vector<128x256xf32> to vector<128x256xbf16>
    %cst_23 = arith.constant 0.000000e+00 : bf16
    %31 = vector.broadcast %cst_23 : bf16 to vector<128x256xbf16>
    %32 = arith.maximumf %30, %31 : vector<128x256xbf16>
    %c0_24 = arith.constant 0 : index
    %c0_25 = arith.constant 0 : index
    %33 = vector.load %arg10[%c0_24, %c0_25] : memref<8x256xbf16, #tpu.memory_space<vmem>>, vector<8x256xbf16>
    %cst_26 = arith.constant dense<0.000000e+00> : vector<8x128xf32>
    %34 = tpu.matmul %33, %32, %cst_26 {dimension_numbers = #tpu.dot_dimension_numbers<[1], [1], [0], [0], [0, 0, 1, 0], [], []>} : vector<8x256xbf16>, vector<128x256xbf16>, vector<8x128xf32> -> vector<8x128xf32>
    %c0_27 = arith.constant 0 : index
    %c0_28 = arith.constant 0 : index
    %35 = vector.load %arg11[%c0_27, %c0_28] : memref<1x1xf32, #tpu.memory_space<vmem>>, vector<1x1xf32>
    %36 = vector.broadcast %35 : vector<1x1xf32> to vector<8x128xf32>
    %37 = arith.addf %34, %36 : vector<8x128xf32>
    %38 = vector.extract_strided_slice %37 {offsets = [0, 0], sizes = [1, 128], strides = [1, 1]} : vector<8x128xf32> to vector<1x128xf32>
    %39 = vector.shape_cast %38 : vector<1x128xf32> to vector<1x1x128xf32>
    %c0_29 = arith.constant 0 : index
    %c0_30 = arith.constant 0 : index
    %c0_31 = arith.constant 0 : index
    %40 = vector.load %arg12[%c0_29, %c0_30, %c0_31] : memref<1x1x128xf32, #tpu.memory_space<vmem>>, vector<1x1x128xf32>
    tpu.vector_store %arg12[%c0_29, %c0_30, %c0_31], %39 {strides = array<i32>} : memref<1x1x128xf32, #tpu.memory_space<vmem>>, vector<1x1x128xf32>,
    return
  }
  func.func @transform_0(%arg0: i32) -> (i32, i32) {
    %c0_i32 = arith.constant 0 : i32
    %c0_i32_0 = arith.constant 0 : i32
    return %arg0, %c0_i32 : i32, i32
  }
  func.func @transform_1(%arg0: i32) -> (i32, i32) {
    %c0_i32 = arith.constant 0 : i32
    %c0_i32_0 = arith.constant 0 : i32
    %c0_i32_1 = arith.constant 0 : i32
    return %c0_i32, %c0_i32_0 : i32, i32
  }
  func.func @transform_2(%arg0: i32) -> (i32, i32) {
    %c0_i32 = arith.constant 0 : i32
    %c0_i32_0 = arith.constant 0 : i32
    %c0_i32_1 = arith.constant 0 : i32
    return %c0_i32, %c0_i32_0 : i32, i32
  }
  func.func @transform_3(%arg0: i32) -> (i32, i32) {
    %c0_i32 = arith.constant 0 : i32
    %c0_i32_0 = arith.constant 0 : i32
    %c0_i32_1 = arith.constant 0 : i32
    return %c0_i32, %c0_i32_0 : i32, i32
  }
  func.func @transform_4(%arg0: i32) -> (i32, i32) {
    %c0_i32 = arith.constant 0 : i32
    %c0_i32_0 = arith.constant 0 : i32
    %c0_i32_1 = arith.constant 0 : i32
    return %c0_i32, %c0_i32_0 : i32, i32
  }
  func.func @transform_5(%arg0: i32) -> (i32, i32) {
    %c0_i32 = arith.constant 0 : i32
    %c0_i32_0 = arith.constant 0 : i32
    %c0_i32_1 = arith.constant 0 : i32
    return %c0_i32, %c0_i32_0 : i32, i32
  }
  func.func @transform_6(%arg0: i32) -> (i32, i32) {
    %c0_i32 = arith.constant 0 : i32
    %c0_i32_0 = arith.constant 0 : i32
    %c0_i32_1 = arith.constant 0 : i32
    return %c0_i32, %c0_i32_0 : i32, i32
  }
  func.func @transform_7(%arg0: i32) -> (i32, i32) {
    %c0_i32 = arith.constant 0 : i32
    %c0_i32_0 = arith.constant 0 : i32
    %c0_i32_1 = arith.constant 0 : i32
    return %c0_i32, %c0_i32_0 : i32, i32
  }
  func.func @transform_8(%arg0: i32) -> (i32, i32) {
    %c0_i32 = arith.constant 0 : i32
    %c0_i32_0 = arith.constant 0 : i32
    %c0_i32_1 = arith.constant 0 : i32
    return %c0_i32, %c0_i32_0 : i32, i32
  }
  func.func @transform_9(%arg0: i32) -> (i32, i32) {
    %c0_i32 = arith.constant 0 : i32
    %c0_i32_0 = arith.constant 0 : i32
    %c0_i32_1 = arith.constant 0 : i32
    return %c0_i32, %c0_i32_0 : i32, i32
  }
  func.func @transform_10(%arg0: i32) -> (i32, i32) {
    %c0_i32 = arith.constant 0 : i32
    %c0_i32_0 = arith.constant 0 : i32
    %c0_i32_1 = arith.constant 0 : i32
    return %c0_i32, %c0_i32_0 : i32, i32
  }
  func.func @transform_11(%arg0: i32) -> (i32, i32, i32) {
    %c0_i32 = arith.constant 0 : i32
    %c0_i32_0 = arith.constant 0 : i32
    %c0_i32_1 = arith.constant 0 : i32
    return %arg0, %c0_i32, %c0_i32_0 : i32, i32, i32
  }
}

</mosaic_0001>

<bundles_post_ra>
// kernel: tpu_custom_call.1
= control target key start
LH: loop header
LB: loop body
LE: loop exit
PB: predicated region body
PF: predicated region fallthrough
CT: control target
= control target key end

     0   :  { %s2411_s0 = inlined_call_operand.hbm [shape: bf16[128,128], index: 0, kind: input, shape index: {}]   ;;  %s2412_s1 = inlined_call_operand.hbm [shape: bf16[128,256], index: 1, kind: input, shape index: {}]   ;;  %s2413_s2 = inlined_call_operand.vmem [shape: f32[1,256], index: 2, kind: input, shape index: {}]   ;;  %s2414_s3 = inlined_call_operand.hbm [shape: bf16[256,256], index: 3, kind: input, shape index: {}]   ;;  %s2415_s4 = inlined_call_operand.vmem [shape: f32[1,256], index: 4, kind: input, shape index: {}]   ;;  %s2416_s5 = inlined_call_operand.hbm [shape: bf16[256,256], index: 5, kind: input, shape index: {}]   ;;  %s2417_s6 = inlined_call_operand.vmem [shape: f32[1,256], index: 6, kind: input, shape index: {}]   ;;  %s2418_s7 = inlined_call_operand.hbm [shape: bf16[256,256], index: 7, kind: input, shape index: {}]   ;;  %s2419_s8 = inlined_call_operand.vmem [shape: f32[1,256], index: 8, kind: input, shape index: {}]   ;;  %s2420_s9 = inlined_call_operand.vmem [shape: bf16[8,256], index: 9, kind: input, shape index: {}]   ;;  %s2421_s10 = inlined_call_operand.<no memory space> [shape: f32[1,1], index: 10, kind: input, shape index: {}]   ;;  %s2422_s11 = inlined_call_operand.hbm [shape: f32[1,1,128], index: 11, kind: output, shape index: {}]  }
   0x1   :  { %v16_v0 = vstv %s2421_s10 }
   0x2   :  { %17 = vst [vmem:[#allocation2] sm:$0x1] %v16_v0 }
   0x3   :  { %18 = vsyncpa [#allocation4], 0 }
   0x4   :  { %19 = vsyncpa [#allocation7], 0 }
   0x5   :  { %20 = vsyncpa [#allocation10], 0 }
   0x6   :  { %21 = vsyncpa [#allocation5], 0  ;;  %s2003_s19 = smov [#allocation6]   ;;  %s1863_s23 = scalar_lea.hbm %s2412_s1, 2048 }
   0x7   :  { %s39_s20 = sshll.u32 %s2003_s19, 4  ;;  %p1864_p0 = scmp.ne.s32.totalorder %s2412_s1, %s1863_s23  ;;  %s40_s20 = int_to_ptr.vmem [resolvable:$true] %s39_s20 }
   0x8   :  { %p1867_p1 = scmp.lt.u32.totalorder %s1863_s23, %s2412_s1 }
   0xa   :  { %p1869_p2 = pnand %p1867_p1, %p1864_p0 }
   0xc   :  { %1872 = shalt.err (!%p1869_p2)
}
   0xd   :  { %s1873_s10 = scalar_lea.vmem %s40_s20, 2048  ;;  %p1878_p4 = scmp.lt.s32.totalorder %s40_s20, %s40_s20 }
   0xe   :  { %p1874_p3 = scmp.ne.s32.totalorder %s40_s20, %s1873_s10  ;;  %p1879_p5 = scmp.lt.s32.totalorder %s1873_s10, %s1873_s10 }
  0x10   :  { %p1880_p6 = por %p1879_p5, %p1878_p4 }
  0x12   :  { %p1881_p7 = pnand %p1880_p6, %p1874_p3 }
  0x14   :  { %1884 = shalt.err (!%p1881_p7)
}
  0x15   :  { %s2004_s28 = smov 128   ;;  %s2005_s29 = smov 8  }
  0x16   :  { %45 = dma.hbm_to_vmem [thread:$0]  %s2412_s1, 2048, %s40_s20, [#allocation7], %s2004_s28, %s2004_s28, %s2005_s29  }
  0x17   :  { %s2006_s13 = smov [#allocation9]   ;;  %s2007_s15 = smov [#allocation3]  }
  0x18   :  { %s67_s14 = sshll.u32 %s2006_s13, 4  ;;  %s27_s16 = sshll.u32 %s2007_s15, 4  ;;  %s68_s14 = int_to_ptr.vmem [resolvable:$true] %s67_s14  ;;  %s28_s16 = int_to_ptr.vmem [resolvable:$true] %s27_s16 }
  0x19   :  { %s1885_s19 = scalar_lea.hbm %s2416_s5, 4096 }
  0x1a   :  { %p1886_p8 = scmp.ne.s32.totalorder %s2416_s5, %s1885_s19  ;;  %p1889_p9 = scmp.lt.u32.totalorder %s1885_s19, %s2416_s5 }
  0x1c   :  { %p1891_p10 = pnand %p1889_p9, %p1886_p8 }
  0x1e   :  { %1894 = shalt.err (!%p1891_p10)
}
  0x1f   :  { %s1895_s1 = scalar_lea.vmem %s68_s14, 4096  ;;  %p1900_p12 = scmp.lt.s32.totalorder %s68_s14, %s68_s14 }
  0x20   :  { %p1896_p11 = scmp.ne.s32.totalorder %s68_s14, %s1895_s1  ;;  %p1901_p13 = scmp.lt.s32.totalorder %s1895_s1, %s1895_s1 }
  0x22   :  { %p1902_p0 = por %p1901_p13, %p1900_p12 }
  0x24   :  { %p1903_p1 = pnand %p1902_p0, %p1896_p11 }
  0x26   :  { %1906 = shalt.err (!%p1903_p1)
}
  0x27   :  { %73 = dma.hbm_to_vmem [thread:$0]  %s2416_s5, 4096, %s68_s14, [#allocation10], %s2004_s28, %s2004_s28, %s2005_s29  }
  0x28   :  { %s1907_s10 = scalar_lea.hbm %s2411_s0, 1024 }
  0x29   :  { %p1908_p2 = scmp.ne.s32.totalorder %s2411_s0, %s1907_s10  ;;  %p1911_p3 = scmp.lt.u32.totalorder %s1907_s10, %s2411_s0 }
  0x2b   :  { %p1913_p4 = pnand %p1911_p3, %p1908_p2 }
  0x2d   :  { %1916 = shalt.err (!%p1913_p4)
}
  0x2e   :  { %s1917_s17 = scalar_lea.vmem %s28_s16, 1024  ;;  %p1922_p6 = scmp.lt.s32.totalorder %s28_s16, %s28_s16 }
  0x2f   :  { %p1918_p5 = scmp.ne.s32.totalorder %s28_s16, %s1917_s17  ;;  %p1923_p7 = scmp.lt.s32.totalorder %s1917_s17, %s1917_s17 }
  0x31   :  { %p1924_p8 = por %p1923_p7, %p1922_p6 }
  0x33   :  { %p1925_p9 = pnand %p1924_p8, %p1918_p5 }
  0x35   :  { %1928 = shalt.err (!%p1925_p9)
}
  0x36   :  { %s2008_s5 = smov 64   ;;  %s2009_s14 = smov 4  }
  0x37   :  { %33 = dma.hbm_to_vmem [thread:$0]  %s2411_s0, 1024, %s28_s16, [#allocation4], %s2008_s5, %s2008_s5, %s2009_s14  }
  0x38   :  { %s2010_s21 = smov [#allocation8]   ;;  %s2011_s23 = smov [#allocation11]  }
  0x39   :  { %s53_s22 = sshll.u32 %s2010_s21, 4  ;;  %s81_s24 = sshll.u32 %s2011_s23, 4  ;;  %s54_s22 = int_to_ptr.vmem [resolvable:$true] %s53_s22  ;;  %s82_s24 = int_to_ptr.vmem [resolvable:$true] %s81_s24 }
  0x3a   :  { %s1929_s25 = scalar_lea.hbm %s2414_s3, 4096 }
  0x3b   :  { %p1930_p10 = scmp.ne.s32.totalorder %s2414_s3, %s1929_s25  ;;  %p1933_p11 = scmp.lt.u32.totalorder %s1929_s25, %s2414_s3 }
  0x3d   :  { %p1935_p12 = pnand %p1933_p11, %p1930_p10 }
  0x3f   :  { %1938 = shalt.err (!%p1935_p12)
}
  0x40   :  { %s1939_s0 = scalar_lea.vmem %s54_s22, 4096  ;;  %p1944_p0 = scmp.lt.s32.totalorder %s54_s22, %s54_s22 }
  0x41   :  { %p1940_p13 = scmp.ne.s32.totalorder %s54_s22, %s1939_s0  ;;  %p1945_p1 = scmp.lt.s32.totalorder %s1939_s0, %s1939_s0 }
  0x43   :  { %p1946_p2 = por %p1945_p1, %p1944_p0 }
  0x45   :  { %p1947_p3 = pnand %p1946_p2, %p1940_p13 }
  0x47   :  { %1950 = shalt.err (!%p1947_p3)
}
  0x48   :  { %59 = dma.hbm_to_vmem [thread:$0]  %s2414_s3, 4096, %s54_s22, [#allocation7], %s2004_s28, %s2004_s28, %s2005_s29  }
  0x49   :  { %s1951_s17 = scalar_lea.hbm %s2418_s7, 4096 }
  0x4a   :  { %p1952_p4 = scmp.ne.s32.totalorder %s2418_s7, %s1951_s17  ;;  %p1955_p5 = scmp.lt.u32.totalorder %s1951_s17, %s2418_s7 }
  0x4c   :  { %p1957_p6 = pnand %p1955_p5, %p1952_p4 }
  0x4e   :  { %1960 = shalt.err (!%p1957_p6)
}
  0x4f   :  { %s1961_s21 = scalar_lea.vmem %s82_s24, 4096  ;;  %p1966_p8 = scmp.lt.s32.totalorder %s82_s24, %s82_s24 }
  0x50   :  { %p1962_p7 = scmp.ne.s32.totalorder %s82_s24, %s1961_s21  ;;  %p1967_p9 = scmp.lt.s32.totalorder %s1961_s21, %s1961_s21 }
  0x52   :  { %p1968_p10 = por %p1967_p9, %p1966_p8 }
  0x54   :  { %p1969_p11 = pnand %p1968_p10, %p1962_p7 }
  0x56   :  { %1972 = shalt.err (!%p1969_p11)
}
  0x57   :  { %87 = dma.hbm_to_vmem [thread:$0]  %s2418_s7, 4096, %s82_s24, [#allocation10], %s2004_s28, %s2004_s28, %s2005_s29  }
  0x58   :  { %1995 = dma.done.wait [#allocation4], 1024  }
  0x59   :  { %1996 = vsyncadd [#allocation4], 4294966272 }
  0x5a   :  { %1997 = dma.done.wait [#allocation7], 6144  }
  0x5b   :  { %1998 = vsyncadd [#allocation7], 4294961152 }
  0x5c   :  { %1999 = dma.done.wait [#allocation10], 8192  }
  0x5d   :  { %2000 = vsyncadd [#allocation10], 4294959104  ;;  %v2012_v1 = vmov 0   ;;  %v1685_v2 = vld [vmem:[#allocation6 + $0x4] ss:$8 sps:$4 sm:$0xff]   ;;  %v1711_v35 = vld [vmem:[#allocation3 + $0x10] sm:$0xff]  }
  0x5e   :  { %314 = vmatprep.mubr.bf16.mxu0 %v2012_v1  ;;  %1684 = vset.pattern.permute.xlu0 %v2012_v1  ;;  %v1687_v3 = vld [vmem:[#allocation6] ss:$8 sps:$4 sm:$0xff]   ;;  %v1688_v4 = vld [vmem:[#allocation6 + $0x14] ss:$8 sps:$4 sm:$0xff]   ;;  %v1690_v5 = vld [vmem:[#allocation6 + $0x10] ss:$8 sps:$4 sm:$0xff]  }
  0x5f   :  { %282 = vmatprep.subr.bf16.mxu0 %v1685_v2  ;;  %v1691_v6 = vld [vmem:[#allocation6 + $0x24] ss:$8 sps:$4 sm:$0xff]   ;;  %v1693_v7 = vld [vmem:[#allocation6 + $0x20] ss:$8 sps:$4 sm:$0xff]   ;;  %v1694_v8 = vld [vmem:[#allocation6 + $0x34] ss:$8 sps:$4 sm:$0xff]  }
  0x60   :  { %283 = vmatpush1.bf16.msra.mxu0 %v1687_v3  ;;  %v1696_v9 = vld [vmem:[#allocation6 + $0x30] ss:$8 sps:$4 sm:$0xff]   ;;  %v1697_v10 = vld [vmem:[#allocation6 + $0x44] ss:$8 sps:$4 sm:$0xff]   ;;  %v1699_v11 = vld [vmem:[#allocation6 + $0x40] ss:$8 sps:$4 sm:$0xff]  }
  0x61   :  { %284 = vmatprep.subr.bf16.mxu0 %v1688_v4  ;;  %v1700_v12 = vld [vmem:[#allocation6 + $0x54] ss:$8 sps:$4 sm:$0xff]   ;;  %v1702_v13 = vld [vmem:[#allocation6 + $0x50] ss:$8 sps:$4 sm:$0xff]   ;;  %v1703_v14 = vld [vmem:[#allocation6 + $0x64] ss:$8 sps:$4 sm:$0xff]  }
  0x62   :  { %v1717_v15 = vld [vmem:[#allocation8 + $0x4] ss:$8 sps:$4 sm:$0xff]   ;;  %v1719_v16 = vld [vmem:[#allocation8] ss:$8 sps:$4 sm:$0xff]   ;;  %v1720_v17 = vld [vmem:[#allocation8 + $0x14] ss:$8 sps:$4 sm:$0xff]  }
  0x63   :  { %631 = vmatprep.subr.bf16.mxu1 %v1717_v15  ;;  %v1722_v18 = vld [vmem:[#allocation8 + $0x10] ss:$8 sps:$4 sm:$0xff]   ;;  %v1705_v19 = vld [vmem:[#allocation6 + $0x60] ss:$8 sps:$4 sm:$0xff]   ;;  %v1723_v20 = vld [vmem:[#allocation8 + $0x24] ss:$8 sps:$4 sm:$0xff]  }
  0x64   :  { %285 = vmatpush1.bf16.msra.mxu0 %v1690_v5  ;;  %632 = vmatpush1.bf16.msra.mxu1 %v1719_v16  ;;  %v1706_v21 = vld [vmem:[#allocation6 + $0x74] ss:$8 sps:$4 sm:$0xff]   ;;  %v1725_v22 = vld [vmem:[#allocation8 + $0x20] ss:$8 sps:$4 sm:$0xff]   ;;  %v1708_v23 = vld [vmem:[#allocation6 + $0x70] ss:$8 sps:$4 sm:$0xff]  }
  0x65   :  { %286 = vmatprep.subr.bf16.mxu0 %v1691_v6  ;;  %633 = vmatprep.subr.bf16.mxu1 %v1720_v17  ;;  %v1726_v24 = vld [vmem:[#allocation8 + $0x34] ss:$8 sps:$4 sm:$0xff]   ;;  %v1709_v25 = vld [vmem:[#allocation3] sm:$0xff]   ;;  %v1728_v26 = vld [vmem:[#allocation8 + $0x30] ss:$8 sps:$4 sm:$0xff]  }
  0x66   :  { %v1729_v27 = vld [vmem:[#allocation8 + $0x44] ss:$8 sps:$4 sm:$0xff]   ;;  %v1731_v28 = vld [vmem:[#allocation8 + $0x40] ss:$8 sps:$4 sm:$0xff]   ;;  %v1732_v29 = vld [vmem:[#allocation8 + $0x54] ss:$8 sps:$4 sm:$0xff]  }
  0x67   :  { %v1710_v30 = vld [vmem:[#allocation3 + $0x8] sm:$0xff]   ;;  %v1734_v31 = vld [vmem:[#allocation8 + $0x50] ss:$8 sps:$4 sm:$0xff]   ;;  %v1738_v34 = vld [vmem:[#allocation8 + $0x74] ss:$8 sps:$4 sm:$0xff]  }
  0x68   :  { %287 = vmatpush1.bf16.msra.mxu0 %v1693_v7  ;;  %634 = vmatpush1.bf16.msra.mxu1 %v1722_v18  ;;  %v1735_v32 = vld [vmem:[#allocation8 + $0x64] ss:$8 sps:$4 sm:$0xff]   ;;  %v1737_v33 = vld [vmem:[#allocation8 + $0x60] ss:$8 sps:$4 sm:$0xff]   ;;  %v1740_v36 = vld [vmem:[#allocation8 + $0x70] ss:$8 sps:$4 sm:$0xff]  }
  0x69   :  { %288 = vmatprep.subr.bf16.mxu0 %v1694_v8  ;;  %635 = vmatprep.subr.bf16.mxu1 %v1723_v20  ;;  %v1741_v37 = vld [vmem:[#allocation8 + $0x84] ss:$8 sps:$4 sm:$0xff]   ;;  %v1743_v38 = vld [vmem:[#allocation8 + $0x80] ss:$8 sps:$4 sm:$0xff]   ;;  %v1744_v39 = vld [vmem:[#allocation8 + $0x94] ss:$8 sps:$4 sm:$0xff]  }
  0x6a   :  { %v1712_v40 = vld [vmem:[#allocation3 + $0x18] sm:$0xff]   ;;  %v1747_v42 = vld [vmem:[#allocation8 + $0xa4] ss:$8 sps:$4 sm:$0xff]   ;;  %v1749_v43 = vld [vmem:[#allocation8 + $0xa0] ss:$8 sps:$4 sm:$0xff]  }
  0x6b   :  { %v1746_v41 = vld [vmem:[#allocation8 + $0x90] ss:$8 sps:$4 sm:$0xff]   ;;  %v1750_v44 = vld [vmem:[#allocation8 + $0xb4] ss:$8 sps:$4 sm:$0xff]   ;;  %v1713_v45 = vld [vmem:[#allocation3 + $0x20] sm:$0xff]  }
  0x6c   :  { %289 = vmatpush1.bf16.msra.mxu0 %v1696_v9  ;;  %636 = vmatpush1.bf16.msra.mxu1 %v1725_v22  ;;  %v1752_v46 = vld [vmem:[#allocation8 + $0xb0] ss:$8 sps:$4 sm:$0xff]   ;;  %v1753_v47 = vld [vmem:[#allocation8 + $0xc4] ss:$8 sps:$4 sm:$0xff]   ;;  %v1755_v48 = vld [vmem:[#allocation8 + $0xc0] ss:$8 sps:$4 sm:$0xff]  }
  0x6d   :  { %290 = vmatprep.subr.bf16.mxu0 %v1697_v10  ;;  %637 = vmatprep.subr.bf16.mxu1 %v1726_v24  ;;  %v1756_v49 = vld [vmem:[#allocation8 + $0xd4] ss:$8 sps:$4 sm:$0xff]   ;;  %v1714_v50 = vld [vmem:[#allocation3 + $0x28] sm:$0xff]   ;;  %v1758_v53 = vld [vmem:[#allocation8 + $0xd0] ss:$8 sps:$4 sm:$0xff]  }
  0x6e   :  { %v1715_v51 = vld [vmem:[#allocation3 + $0x30] sm:$0xff]   ;;  %v1716_v52 = vld [vmem:[#allocation3 + $0x38] sm:$0xff]   ;;  %v1759_v54 = vld [vmem:[#allocation8 + $0xe4] ss:$8 sps:$4 sm:$0xff]  }
  0x6f   :  { %v1761_v55 = vld [vmem:[#allocation8 + $0xe0] ss:$8 sps:$4 sm:$0xff]   ;;  %v1762_v56 = vld [vmem:[#allocation8 + $0xf4] ss:$8 sps:$4 sm:$0xff]   ;;  %v1764_v57 = vld [vmem:[#allocation8 + $0xf0] ss:$8 sps:$4 sm:$0xff]  }
  0x70   :  { %291 = vmatpush1.bf16.msra.mxu0 %v1699_v11  ;;  %638 = vmatpush1.bf16.msra.mxu1 %v1728_v26  ;;  %v1765_v58 = vld [vmem:[#allocation9] ss:$8 sps:$4 sm:$0xff]   ;;  %v1767_v59 = vld [vmem:[#allocation9 + $0x4] ss:$8 sps:$4 sm:$0xff]   ;;  %v1770_v60 = vld [vmem:[#allocation9 + $0x14] ss:$8 sps:$4 sm:$0xff]  }
  0x71   :  { %292 = vmatprep.subr.bf16.mxu0 %v1700_v12  ;;  %639 = vmatprep.subr.bf16.mxu1 %v1729_v27  ;;  %v1768_v61 = vld [vmem:[#allocation9 + $0x10] ss:$8 sps:$4 sm:$0xff]   ;;  %v1773_v62 = vld [vmem:[#allocation9 + $0x24] ss:$8 sps:$4 sm:$0xff]   ;;  %v1771_v63 = vld [vmem:[#allocation9 + $0x20] ss:$8 sps:$4 sm:$0xff]  }
  0x72   :  { %v1776_v0 = vld [vmem:[#allocation9 + $0x34] ss:$8 sps:$4 sm:$0xff]   ;;  %v1774_v2 = vld [vmem:[#allocation9 + $0x30] ss:$8 sps:$4 sm:$0xff]   ;;  %v1779_v3 = vld [vmem:[#allocation9 + $0x44] ss:$8 sps:$4 sm:$0xff]  }
  0x73   :  { %v1777_v4 = vld [vmem:[#allocation9 + $0x40] ss:$8 sps:$4 sm:$0xff]   ;;  %v1782_v5 = vld [vmem:[#allocation9 + $0x54] ss:$8 sps:$4 sm:$0xff]   ;;  %v1780_v6 = vld [vmem:[#allocation9 + $0x50] ss:$8 sps:$4 sm:$0xff]  }
  0x74   :  { %293 = vmatpush1.bf16.msra.mxu0 %v1702_v13  ;;  %640 = vmatpush1.bf16.msra.mxu1 %v1731_v28  ;;  %v1785_v7 = vld [vmem:[#allocation9 + $0x64] ss:$8 sps:$4 sm:$0xff]   ;;  %v1783_v8 = vld [vmem:[#allocation9 + $0x60] ss:$8 sps:$4 sm:$0xff]   ;;  %v1788_v9 = vld [vmem:[#allocation9 + $0x74] ss:$8 sps:$4 sm:$0xff]  }
  0x75   :  { %294 = vmatprep.subr.bf16.mxu0 %v1703_v14  ;;  %641 = vmatprep.subr.bf16.mxu1 %v1732_v29  ;;  %v1786_v10 = vld [vmem:[#allocation9 + $0x70] ss:$8 sps:$4 sm:$0xff]   ;;  %v1791_v11 = vld [vmem:[#allocation9 + $0x84] ss:$8 sps:$4 sm:$0xff]   ;;  %v1789_v12 = vld [vmem:[#allocation9 + $0x80] ss:$8 sps:$4 sm:$0xff]  }
  0x76   :  { %v1794_v13 = vld [vmem:[#allocation9 + $0x94] ss:$8 sps:$4 sm:$0xff]   ;;  %v1792_v14 = vld [vmem:[#allocation9 + $0x90] ss:$8 sps:$4 sm:$0xff]   ;;  %v1797_v15 = vld [vmem:[#allocation9 + $0xa4] ss:$8 sps:$4 sm:$0xff]  }
  0x77   :  { %v1795_v16 = vld [vmem:[#allocation9 + $0xa0] ss:$8 sps:$4 sm:$0xff]   ;;  %v1800_v17 = vld [vmem:[#allocation9 + $0xb4] ss:$8 sps:$4 sm:$0xff]   ;;  %v1798_v18 = vld [vmem:[#allocation9 + $0xb0] ss:$8 sps:$4 sm:$0xff]  }
  0x78   :  { %295 = vmatpush1.bf16.msra.mxu0 %v1705_v19  ;;  %642 = vmatpush1.bf16.msra.mxu1 %v1734_v31  ;;  %v1803_v19 = vld [vmem:[#allocation9 + $0xc4] ss:$8 sps:$4 sm:$0xff]   ;;  %v1801_v20 = vld [vmem:[#allocation9 + $0xc0] ss:$8 sps:$4 sm:$0xff]   ;;  %v1806_v22 = vld [vmem:[#allocation9 + $0xd4] ss:$8 sps:$4 sm:$0xff]  }
  0x79   :  { %296 = vmatprep.subr.bf16.mxu0 %v1706_v21  ;;  %643 = vmatprep.subr.bf16.mxu1 %v1735_v32  ;;  %v144_v21 = vlaneseq  ;;  %v142_v26 = vld [vmem:[%s2413_s2] sm:$0x3] }
  0x7b   :  { %v145_v24 = vshrl.u32 %v144_v21, 7 }
  0x7c   :  { %297 = vmatpush1.bf16.msra.mxu0 %v1708_v23  ;;  %644 = vmatpush1.bf16.msra.mxu1 %v1737_v33  ;;  %v1804_v23 = vld [vmem:[#allocation9 + $0xd0] ss:$8 sps:$4 sm:$0xff]  }
  0x7d   :  { %645 = vmatprep.subr.bf16.mxu1 %v1738_v34  ;;  %980 = vmatprep.subr.bf16.mxu0 %v1767_v59  ;;  %v2163_v27 = vsub.s32 1, %v145_v24 }
  0x7f   :  { %315 = vmatmul.mubr.bf16.vlgmr.msra.gmra.mrb[0].mxu0 %v1709_v25  ;;  %v2158_v25 = vsub.s32 0, %v145_v24 }
  0x80   :  { %324 = vmatprep.mubr.bf16.mxu0 %v2012_v1  ;;  %646 = vmatpush1.bf16.msra.mxu1 %v1740_v36 }
  0x81   :  { %647 = vmatprep.subr.bf16.mxu1 %v1741_v37  ;;  %981 = vmatpush1.bf16.msra.mxu0 %v1765_v58  ;;  %v2166_v28 = vrot.slane %v142_v26, %v2158_v25 }
  0x82   :  { %982 = vmatprep.subr.bf16.mxu0 %v1770_v60 }
  0x84   :  { %648 = vmatpush1.bf16.msra.mxu1 %v1743_v38 }
  0x85   :  { %649 = vmatprep.subr.bf16.mxu1 %v1744_v39  ;;  %983 = vmatpush1.bf16.msra.mxu0 %v1768_v61 }
  0x86   :  { %984 = vmatprep.subr.bf16.mxu0 %v1773_v62 }
  0x87   :  { %325 = vmatmul.mubr.bf16.gmra.mrb[4].mxu0 %v1710_v30  ;;  %v2169_v30 = vrot.slane %v142_v26, %v2163_v27 }
  0x88   :  { %334 = vmatprep.mubr.bf16.mxu0 %v2012_v1  ;;  %650 = vmatpush1.bf16.msra.mxu1 %v1746_v41 }
  0x89   :  { %651 = vmatprep.subr.bf16.mxu1 %v1747_v42  ;;  %985 = vmatpush1.bf16.msra.mxu0 %v1771_v63 }
  0x8a   :  { %986 = vmatprep.subr.bf16.mxu0 %v1776_v0 }
  0x8c   :  { %652 = vmatpush1.bf16.msra.mxu1 %v1749_v43 }
  0x8d   :  { %653 = vmatprep.subr.bf16.mxu1 %v1750_v44  ;;  %987 = vmatpush1.bf16.msra.mxu0 %v1774_v2 }
  0x8e   :  { %988 = vmatprep.subr.bf16.mxu0 %v1779_v3 }
  0x8f   :  { %335 = vmatmul.mubr.bf16.gmra.mrb[8].mxu0 %v1711_v35 }
  0x90   :  { %344 = vmatprep.mubr.bf16.mxu0 %v2012_v1  ;;  %654 = vmatpush1.bf16.msra.mxu1 %v1752_v46 }
  0x91   :  { %655 = vmatprep.subr.bf16.mxu1 %v1753_v47  ;;  %989 = vmatpush1.bf16.msra.mxu0 %v1777_v4 }
  0x92   :  { %990 = vmatprep.subr.bf16.mxu0 %v1782_v5 }
  0x94   :  { %656 = vmatpush1.bf16.msra.mxu1 %v1755_v48 }
  0x95   :  { %657 = vmatprep.subr.bf16.mxu1 %v1756_v49  ;;  %991 = vmatpush1.bf16.msra.mxu0 %v1780_v6 }
  0x96   :  { %992 = vmatprep.subr.bf16.mxu0 %v1785_v7 }
  0x97   :  { %345 = vmatmul.mubr.bf16.gmra.mrb[12].mxu0 %v1712_v40 }
  0x98   :  { %354 = vmatprep.mubr.bf16.mxu0 %v2012_v1  ;;  %658 = vmatpush1.bf16.msra.mxu1 %v1758_v53 }
  0x99   :  { %659 = vmatprep.subr.bf16.mxu1 %v1759_v54  ;;  %993 = vmatpush1.bf16.msra.mxu0 %v1783_v8 }
  0x9a   :  { %994 = vmatprep.subr.bf16.mxu0 %v1788_v9 }
  0x9c   :  { %660 = vmatpush1.bf16.msra.mxu1 %v1761_v55 }
  0x9d   :  { %661 = vmatprep.subr.bf16.mxu1 %v1762_v56  ;;  %995 = vmatpush1.bf16.msra.mxu0 %v1786_v10 }
  0x9e   :  { %996 = vmatprep.subr.bf16.mxu0 %v1791_v11 }
  0x9f   :  { %355 = vmatmul.mubr.bf16.gmra.mrb[16].mxu0 %v1713_v45 }
  0xa0   :  { %364 = vmatprep.mubr.bf16.mxu0 %v2012_v1  ;;  %662 = vmatpush1.bf16.msra.mxu1 %v1764_v57 }
  0xa1   :  { %997 = vmatpush1.bf16.msra.mxu0 %v1789_v12 }
  0xa2   :  { %998 = vmatprep.subr.bf16.mxu0 %v1794_v13 }
  0xa5   :  { %999 = vmatpush1.bf16.msra.mxu0 %v1792_v14 }
  0xa6   :  { %1000 = vmatprep.subr.bf16.mxu0 %v1797_v15 }
  0xa7   :  { %365 = vmatmul.mubr.bf16.gmra.mrb[20].mxu0 %v1714_v50 }
  0xa8   :  { %374 = vmatprep.mubr.bf16.mxu0 %v2012_v1 }
  0xa9   :  { %1001 = vmatpush1.bf16.msra.mxu0 %v1795_v16 }
  0xaa   :  { %1002 = vmatprep.subr.bf16.mxu0 %v1800_v17 }
  0xad   :  { %1003 = vmatpush1.bf16.msra.mxu0 %v1798_v18 }
  0xae   :  { %1004 = vmatprep.subr.bf16.mxu0 %v1803_v19 }
  0xaf   :  { %375 = vmatmul.mubr.bf16.gmra.mrb[24].mxu0 %v1715_v51 }
  0xb0   :  { %384 = vmatprep.mubr.bf16.mxu0 %v2012_v1 }
  0xb1   :  { %1005 = vmatpush1.bf16.msra.mxu0 %v1801_v20 }
  0xb2   :  { %1006 = vmatprep.subr.bf16.mxu0 %v1806_v22 }
  0xb5   :  { %1007 = vmatpush1.bf16.msra.mxu0 %v1804_v23 }
  0xb7   :  { %385 = vmatmul.mubr.bf16.gmra.mrb[28].mxu0 %v1716_v52 }
 0x152   :  { %v316_v29 = vpop.f32.mrb[0].mxu0 }
 0x153   :  { %v318_v31 = vpop.f32.mrb[1].mxu0  ;;  %v317_v33 = vadd.f32 %v316_v29, %v2166_v28 }
 0x154   :  { %v320_v32 = vpop.f32.mrb[2].mxu0  ;;  %v319_v36 = vadd.f32 %v318_v31, %v2169_v30 }
 0x155   :  { %v321_v34 = vadd.f32 %v320_v32, %v2166_v28  ;;  %v322_v35 = vpop.f32.mrb[3].mxu0 }
 0x156   :  { %v323_v37 = vadd.f32 %v322_v35, %v2169_v30 }
 0x157   :  { %v395_v38 = vpack.c.bf16 %v321_v34, %v317_v33 }
 0x158   :  { %v396_v39 = vpack.c.bf16 %v323_v37, %v319_v36 }
 0x159   :  { %v411_v43 = vmax.bf16 %v2012_v1, %v395_v38 }
 0x15a   :  { %v326_v40 = vpop.f32.mrb[4].mxu0  ;;  %v412_v41 = vmax.bf16 %v2012_v1, %v396_v39 }
 0x15b   :  { %v328_v42 = vpop.f32.mrb[5].mxu0  ;;  %v327_v45 = vadd.f32 %v326_v40, %v2166_v28 }
 0x15c   :  { %v330_v44 = vpop.f32.mrb[6].mxu0  ;;  %663 = vmatprep.mubr.bf16.mxu1 %v412_v41  ;;  %v329_v48 = vadd.f32 %v328_v42, %v2169_v30 }
 0x15d   :  { %v331_v46 = vadd.f32 %v330_v44, %v2166_v28  ;;  %v332_v47 = vpop.f32.mrb[7].mxu0  ;;  %664 = vmatmul.mubr.bf16.vlgmr.msra.gmra.mrb[0].mxu1 %v411_v43 }
 0x15e   :  { %v333_v49 = vadd.f32 %v332_v47, %v2169_v30 }
 0x15f   :  { %v397_v50 = vpack.c.bf16 %v331_v46, %v327_v45 }
 0x160   :  { %v398_v51 = vpack.c.bf16 %v333_v49, %v329_v48 }
 0x161   :  { %v413_v55 = vmax.bf16 %v2012_v1, %v397_v50 }
 0x162   :  { %v336_v52 = vpop.f32.mrb[8].mxu0  ;;  %v414_v53 = vmax.bf16 %v2012_v1, %v398_v51 }
 0x163   :  { %v338_v54 = vpop.f32.mrb[9].mxu0  ;;  %v337_v57 = vadd.f32 %v336_v52, %v2166_v28 }
 0x164   :  { %v340_v56 = vpop.f32.mrb[10].mxu0  ;;  %673 = vmatprep.mubr.bf16.mxu1 %v414_v53  ;;  %v339_v60 = vadd.f32 %v338_v54, %v2169_v30 }
 0x165   :  { %v341_v58 = vadd.f32 %v340_v56, %v2166_v28  ;;  %v342_v59 = vpop.f32.mrb[11].mxu0  ;;  %674 = vmatmul.mubr.bf16.gmra.mrb[4].mxu1 %v413_v55 }
 0x166   :  { %v343_v61 = vadd.f32 %v342_v59, %v2169_v30 }
 0x167   :  { %v399_v62 = vpack.c.bf16 %v341_v58, %v337_v57 }
 0x168   :  { %v400_v63 = vpack.c.bf16 %v343_v61, %v339_v60 }
 0x169   :  { %v415_v4 = vmax.bf16 %v2012_v1, %v399_v62 }
 0x16a   :  { %v346_v0 = vpop.f32.mrb[12].mxu0  ;;  %v416_v2 = vmax.bf16 %v2012_v1, %v400_v63 }
 0x16b   :  { %v348_v3 = vpop.f32.mrb[13].mxu0  ;;  %v347_v6 = vadd.f32 %v346_v0, %v2166_v28 }
 0x16c   :  { %v350_v5 = vpop.f32.mrb[14].mxu0  ;;  %683 = vmatprep.mubr.bf16.mxu1 %v416_v2  ;;  %v349_v9 = vadd.f32 %v348_v3, %v2169_v30 }
 0x16d   :  { %v351_v7 = vadd.f32 %v350_v5, %v2166_v28  ;;  %v352_v8 = vpop.f32.mrb[15].mxu0  ;;  %684 = vmatmul.mubr.bf16.gmra.mrb[8].mxu1 %v415_v4  ;;  %v1809_v4 = vld [vmem:[#allocation9 + $0xe4] ss:$8 sps:$4 sm:$0xff]   ;;  %v1807_v5 = vld [vmem:[#allocation9 + $0xe0] ss:$8 sps:$4 sm:$0xff]  }
 0x16e   :  { %v353_v10 = vadd.f32 %v352_v8, %v2169_v30  ;;  %1008 = vmatprep.subr.bf16.mxu0 %v1809_v4  ;;  %v1815_v8 = vld [vmem:[#allocation11 + $0x4] ss:$8 sps:$4 sm:$0xff]  }
 0x16f   :  { %v401_v11 = vpack.c.bf16 %v351_v7, %v347_v6  ;;  %1009 = vmatpush1.bf16.msra.mxu0 %v1807_v5  ;;  %v1812_v6 = vld [vmem:[#allocation9 + $0xf4] ss:$8 sps:$4 sm:$0xff]   ;;  %v1813_v7 = vld [vmem:[#allocation11] ss:$8 sps:$4 sm:$0xff]   ;;  %1329 = vmatprep.subr.bf16.mxu1 %v1815_v8 }
 0x170   :  { %v402_v12 = vpack.c.bf16 %v353_v10, %v349_v9  ;;  %1010 = vmatprep.subr.bf16.mxu0 %v1812_v6  ;;  %v1818_v9 = vld [vmem:[#allocation11 + $0x14] ss:$8 sps:$4 sm:$0xff]   ;;  %1330 = vmatpush1.bf16.msra.mxu1 %v1813_v7  ;;  %v1821_v10 = vld [vmem:[#allocation11 + $0x24] ss:$8 sps:$4 sm:$0xff]  }
 0x171   :  { %v417_v16 = vmax.bf16 %v2012_v1, %v401_v11  ;;  %1331 = vmatprep.subr.bf16.mxu1 %v1818_v9  ;;  %v1819_v11 = vld [vmem:[#allocation11 + $0x20] ss:$8 sps:$4 sm:$0xff]  }
 0x172   :  { %v356_v13 = vpop.f32.mrb[16].mxu0  ;;  %v418_v14 = vmax.bf16 %v2012_v1, %v402_v12  ;;  %v1824_v12 = vld [vmem:[#allocation11 + $0x34] ss:$8 sps:$4 sm:$0xff]  }
 0x173   :  { %v358_v15 = vpop.f32.mrb[17].mxu0  ;;  %v357_v18 = vadd.f32 %v356_v13, %v2166_v28  ;;  %v1822_v13 = vld [vmem:[#allocation11 + $0x30] ss:$8 sps:$4 sm:$0xff]  }
 0x174   :  { %v360_v17 = vpop.f32.mrb[18].mxu0  ;;  %693 = vmatprep.mubr.bf16.mxu1 %v418_v14  ;;  %v359_v21 = vadd.f32 %v358_v15, %v2169_v30  ;;  %v1827_v14 = vld [vmem:[#allocation11 + $0x44] ss:$8 sps:$4 sm:$0xff]   ;;  %v1825_v15 = vld [vmem:[#allocation11 + $0x40] ss:$8 sps:$4 sm:$0xff]  }
 0x175   :  { %v361_v19 = vadd.f32 %v360_v17, %v2166_v28  ;;  %v362_v20 = vpop.f32.mrb[19].mxu0  ;;  %694 = vmatmul.mubr.bf16.gmra.mrb[12].mxu1 %v417_v16  ;;  %v1830_v16 = vld [vmem:[#allocation11 + $0x54] ss:$8 sps:$4 sm:$0xff]   ;;  %v1828_v17 = vld [vmem:[#allocation11 + $0x50] ss:$8 sps:$4 sm:$0xff]  }
 0x176   :  { %v363_v22 = vadd.f32 %v362_v20, %v2169_v30  ;;  %v1836_v20 = vld [vmem:[#allocation11 + $0x74] ss:$8 sps:$4 sm:$0xff]  }
 0x177   :  { %v403_v23 = vpack.c.bf16 %v361_v19, %v357_v18  ;;  %v1833_v18 = vld [vmem:[#allocation11 + $0x64] ss:$8 sps:$4 sm:$0xff]   ;;  %v1831_v19 = vld [vmem:[#allocation11 + $0x60] ss:$8 sps:$4 sm:$0xff]  }
 0x178   :  { %v404_v24 = vpack.c.bf16 %v363_v22, %v359_v21  ;;  %v1834_v21 = vld [vmem:[#allocation11 + $0x70] ss:$8 sps:$4 sm:$0xff]   ;;  %v1839_v22 = vld [vmem:[#allocation11 + $0x84] ss:$8 sps:$4 sm:$0xff]  }
 0x179   :  { %v419_v32 = vmax.bf16 %v2012_v1, %v403_v23  ;;  %v1837_v23 = vld [vmem:[#allocation11 + $0x80] ss:$8 sps:$4 sm:$0xff]  }
 0x17a   :  { %v366_v26 = vpop.f32.mrb[20].mxu0  ;;  %v420_v29 = vmax.bf16 %v2012_v1, %v404_v24  ;;  %v1842_v24 = vld [vmem:[#allocation11 + $0x94] ss:$8 sps:$4 sm:$0xff]  }
 0x17b   :  { %v368_v31 = vpop.f32.mrb[21].mxu0  ;;  %v367_v34 = vadd.f32 %v366_v26, %v2166_v28  ;;  %v1840_v26 = vld [vmem:[#allocation11 + $0x90] ss:$8 sps:$4 sm:$0xff]  }
 0x17c   :  { %v370_v33 = vpop.f32.mrb[22].mxu0  ;;  %703 = vmatprep.mubr.bf16.mxu1 %v420_v29  ;;  %v369_v37 = vadd.f32 %v368_v31, %v2169_v30  ;;  %v1845_v29 = vld [vmem:[#allocation11 + $0xa4] ss:$8 sps:$4 sm:$0xff]   ;;  %v1843_v31 = vld [vmem:[#allocation11 + $0xa0] ss:$8 sps:$4 sm:$0xff]  }
 0x17d   :  { %v371_v35 = vadd.f32 %v370_v33, %v2166_v28  ;;  %v372_v36 = vpop.f32.mrb[23].mxu0  ;;  %704 = vmatmul.mubr.bf16.gmra.mrb[16].mxu1 %v419_v32  ;;  %v1848_v32 = vld [vmem:[#allocation11 + $0xb4] ss:$8 sps:$4 sm:$0xff]   ;;  %v1846_v33 = vld [vmem:[#allocation11 + $0xb0] ss:$8 sps:$4 sm:$0xff]  }
 0x17e   :  { %v373_v38 = vadd.f32 %v372_v36, %v2169_v30  ;;  %v1854_v36 = vld [vmem:[#allocation11 + $0xd4] ss:$8 sps:$4 sm:$0xff]  }
 0x17f   :  { %v405_v39 = vpack.c.bf16 %v371_v35, %v367_v34  ;;  %v1851_v34 = vld [vmem:[#allocation11 + $0xc4] ss:$8 sps:$4 sm:$0xff]   ;;  %v1849_v35 = vld [vmem:[#allocation11 + $0xc0] ss:$8 sps:$4 sm:$0xff]  }
 0x180   :  { %v406_v40 = vpack.c.bf16 %v373_v38, %v369_v37  ;;  %v1852_v37 = vld [vmem:[#allocation11 + $0xd0] ss:$8 sps:$4 sm:$0xff]   ;;  %v459_v38 = vld [vmem:[%s2415_s4] sm:$0x3] }
 0x181   :  { %v421_v44 = vmax.bf16 %v2012_v1, %v405_v39  ;;  %v2223_v39 = vrot.slane %v459_v38, %v2158_v25 }
 0x182   :  { %v376_v41 = vpop.f32.mrb[24].mxu0  ;;  %v422_v42 = vmax.bf16 %v2012_v1, %v406_v40 }
 0x183   :  { %v378_v43 = vpop.f32.mrb[25].mxu0  ;;  %v377_v46 = vadd.f32 %v376_v41, %v2166_v28  ;;  %v2226_v41 = vrot.slane %v459_v38, %v2163_v27 }
 0x184   :  { %v380_v45 = vpop.f32.mrb[26].mxu0  ;;  %713 = vmatprep.mubr.bf16.mxu1 %v422_v42  ;;  %v379_v49 = vadd.f32 %v378_v43, %v2169_v30 }
 0x185   :  { %v381_v47 = vadd.f32 %v380_v45, %v2166_v28  ;;  %v382_v48 = vpop.f32.mrb[27].mxu0  ;;  %714 = vmatmul.mubr.bf16.gmra.mrb[20].mxu1 %v421_v44 }
 0x186   :  { %v383_v50 = vadd.f32 %v382_v48, %v2169_v30 }
 0x187   :  { %v407_v51 = vpack.c.bf16 %v381_v47, %v377_v46 }
 0x188   :  { %v408_v52 = vpack.c.bf16 %v383_v50, %v379_v49 }
 0x189   :  { %v423_v56 = vmax.bf16 %v2012_v1, %v407_v51 }
 0x18a   :  { %v386_v53 = vpop.f32.mrb[28].mxu0  ;;  %v424_v54 = vmax.bf16 %v2012_v1, %v408_v52 }
 0x18b   :  { %v388_v55 = vpop.f32.mrb[29].mxu0  ;;  %v387_v58 = vadd.f32 %v386_v53, %v2166_v28 }
 0x18c   :  { %v390_v57 = vpop.f32.mrb[30].mxu0  ;;  %723 = vmatprep.mubr.bf16.mxu1 %v424_v54  ;;  %v389_v61 = vadd.f32 %v388_v55, %v2169_v30 }
 0x18d   :  { %v391_v59 = vadd.f32 %v390_v57, %v2166_v28  ;;  %v392_v60 = vpop.f32.mrb[31].mxu0  ;;  %724 = vmatmul.mubr.bf16.gmra.mrb[24].mxu1 %v423_v56  ;;  %v1810_v28 = vld [vmem:[#allocation9 + $0xf0] ss:$8 sps:$4 sm:$0xff]  }
 0x18e   :  { %v393_v62 = vadd.f32 %v392_v60, %v2169_v30  ;;  %1011 = vmatpush1.bf16.msra.mxu0 %v1810_v28  ;;  %v1816_v30 = vld [vmem:[#allocation11 + $0x10] ss:$8 sps:$4 sm:$0xff]  }
 0x18f   :  { %v409_v63 = vpack.c.bf16 %v391_v59, %v387_v58  ;;  %1332 = vmatpush1.bf16.msra.mxu1 %v1816_v30 }
 0x190   :  { %v410_v0 = vpack.c.bf16 %v393_v62, %v389_v61  ;;  %1333 = vmatprep.subr.bf16.mxu1 %v1821_v10 }
 0x191   :  { %v425_v3 = vmax.bf16 %v2012_v1, %v409_v63 }
 0x192   :  { %v426_v2 = vmax.bf16 %v2012_v1, %v410_v0 }
 0x193   :  { %1334 = vmatpush1.bf16.msra.mxu1 %v1819_v11 }
 0x194   :  { %733 = vmatprep.mubr.bf16.mxu1 %v426_v2  ;;  %1335 = vmatprep.subr.bf16.mxu1 %v1824_v12 }
 0x195   :  { %734 = vmatmul.mubr.bf16.gmra.mrb[28].mxu1 %v425_v3 }
 0x197   :  { %1336 = vmatpush1.bf16.msra.mxu1 %v1822_v13 }
 0x198   :  { %1337 = vmatprep.subr.bf16.mxu1 %v1827_v14 }
 0x19b   :  { %1338 = vmatpush1.bf16.msra.mxu1 %v1825_v15 }
 0x19c   :  { %1339 = vmatprep.subr.bf16.mxu1 %v1830_v16 }
 0x19f   :  { %1340 = vmatpush1.bf16.msra.mxu1 %v1828_v17 }
 0x1a0   :  { %1341 = vmatprep.subr.bf16.mxu1 %v1833_v18 }
 0x1a3   :  { %1342 = vmatpush1.bf16.msra.mxu1 %v1831_v19 }
 0x1a4   :  { %1343 = vmatprep.subr.bf16.mxu1 %v1836_v20 }
 0x1a7   :  { %1344 = vmatpush1.bf16.msra.mxu1 %v1834_v21 }
 0x1a8   :  { %1345 = vmatprep.subr.bf16.mxu1 %v1839_v22 }
 0x1ab   :  { %1346 = vmatpush1.bf16.msra.mxu1 %v1837_v23 }
 0x1ac   :  { %1347 = vmatprep.subr.bf16.mxu1 %v1842_v24 }
 0x1af   :  { %1348 = vmatpush1.bf16.msra.mxu1 %v1840_v26 }
 0x1b0   :  { %1349 = vmatprep.subr.bf16.mxu1 %v1845_v29 }
 0x1b3   :  { %1350 = vmatpush1.bf16.msra.mxu1 %v1843_v31 }
 0x1b4   :  { %1351 = vmatprep.subr.bf16.mxu1 %v1848_v32 }
 0x1b7   :  { %1352 = vmatpush1.bf16.msra.mxu1 %v1846_v33 }
 0x1b8   :  { %1353 = vmatprep.subr.bf16.mxu1 %v1851_v34 }
 0x1bb   :  { %1354 = vmatpush1.bf16.msra.mxu1 %v1849_v35 }
 0x1bc   :  { %1355 = vmatprep.subr.bf16.mxu1 %v1854_v36 }
 0x1bf   :  { %1356 = vmatpush1.bf16.msra.mxu1 %v1852_v37 }
 0x230   :  { %v665_v40 = vpop.f32.mrb[0].mxu1 }
 0x231   :  { %v667_v42 = vpop.f32.mrb[1].mxu1  ;;  %v666_v44 = vadd.f32 %v665_v40, %v2223_v39 }
 0x232   :  { %v669_v43 = vpop.f32.mrb[2].mxu1  ;;  %v668_v47 = vadd.f32 %v667_v42, %v2226_v41 }
 0x233   :  { %v670_v45 = vadd.f32 %v669_v43, %v2223_v39  ;;  %v671_v46 = vpop.f32.mrb[3].mxu1 }
 0x234   :  { %v672_v48 = vadd.f32 %v671_v46, %v2226_v41 }
 0x235   :  { %v744_v49 = vpack.c.bf16 %v670_v45, %v666_v44 }
 0x236   :  { %v745_v50 = vpack.c.bf16 %v672_v48, %v668_v47 }
 0x237   :  { %v760_v53 = vmax.bf16 %v2012_v1, %v744_v49 }
 0x238   :  { %v675_v51 = vpop.f32.mrb[4].mxu1  ;;  %v761_v52 = vmax.bf16 %v2012_v1, %v745_v50 }
 0x239   :  { %v677_v54 = vpop.f32.mrb[5].mxu1  ;;  %v676_v56 = vadd.f32 %v675_v51, %v2223_v39 }
 0x23a   :  { %v679_v55 = vpop.f32.mrb[6].mxu1  ;;  %1012 = vmatprep.mubr.bf16.mxu0 %v761_v52  ;;  %v678_v59 = vadd.f32 %v677_v54, %v2226_v41 }
 0x23b   :  { %v680_v57 = vadd.f32 %v679_v55, %v2223_v39  ;;  %v681_v58 = vpop.f32.mrb[7].mxu1  ;;  %1013 = vmatmul.mubr.bf16.vlgmr.msra.gmra.mrb[32].mxu0 %v760_v53 }
 0x23c   :  { %v682_v60 = vadd.f32 %v681_v58, %v2226_v41 }
 0x23d   :  { %v746_v61 = vpack.c.bf16 %v680_v57, %v676_v56 }
 0x23e   :  { %v747_v62 = vpack.c.bf16 %v682_v60, %v678_v59 }
 0x23f   :  { %v762_v3 = vmax.bf16 %v2012_v1, %v746_v61 }
 0x240   :  { %v685_v63 = vpop.f32.mrb[8].mxu1  ;;  %v763_v0 = vmax.bf16 %v2012_v1, %v747_v62 }
 0x241   :  { %v687_v2 = vpop.f32.mrb[9].mxu1  ;;  %v686_v5 = vadd.f32 %v685_v63, %v2223_v39 }
 0x242   :  { %v689_v4 = vpop.f32.mrb[10].mxu1  ;;  %1022 = vmatprep.mubr.bf16.mxu0 %v763_v0  ;;  %v688_v7 = vadd.f32 %v687_v2, %v2226_v41 }
 0x243   :  { %v690_v6 = vadd.f32 %v689_v4, %v2223_v39  ;;  %v691_v28 = vpop.f32.mrb[11].mxu1  ;;  %1023 = vmatmul.mubr.bf16.gmra.mrb[36].mxu0 %v762_v3 }
 0x244   :  { %v692_v8 = vadd.f32 %v691_v28, %v2226_v41 }
 0x245   :  { %v748_v9 = vpack.c.bf16 %v690_v6, %v686_v5 }
 0x246   :  { %v749_v30 = vpack.c.bf16 %v692_v8, %v688_v7 }
 0x247   :  { %v764_v13 = vmax.bf16 %v2012_v1, %v748_v9 }
 0x248   :  { %v695_v10 = vpop.f32.mrb[12].mxu1  ;;  %v765_v11 = vmax.bf16 %v2012_v1, %v749_v30 }
 0x249   :  { %v697_v12 = vpop.f32.mrb[13].mxu1  ;;  %v696_v15 = vadd.f32 %v695_v10, %v2223_v39 }
 0x24a   :  { %v699_v14 = vpop.f32.mrb[14].mxu1  ;;  %1032 = vmatprep.mubr.bf16.mxu0 %v765_v11  ;;  %v698_v18 = vadd.f32 %v697_v12, %v2226_v41 }
 0x24b   :  { %v700_v16 = vadd.f32 %v699_v14, %v2223_v39  ;;  %v701_v17 = vpop.f32.mrb[15].mxu1  ;;  %1033 = vmatmul.mubr.bf16.gmra.mrb[40].mxu0 %v764_v13  ;;  %v1857_v13 = vld [vmem:[#allocation11 + $0xe4] ss:$8 sps:$4 sm:$0xff]   ;;  %v1855_v14 = vld [vmem:[#allocation11 + $0xe0] ss:$8 sps:$4 sm:$0xff]  }
 0x24c   :  { %v702_v19 = vadd.f32 %v701_v17, %v2226_v41  ;;  %1357 = vmatprep.subr.bf16.mxu1 %v1857_v13 }
 0x24d   :  { %v750_v20 = vpack.c.bf16 %v700_v16, %v696_v15  ;;  %1358 = vmatpush1.bf16.msra.mxu1 %v1855_v14  ;;  %v1860_v15 = vld [vmem:[#allocation11 + $0xf4] ss:$8 sps:$4 sm:$0xff]  }
 0x24e   :  { %v751_v21 = vpack.c.bf16 %v702_v19, %v698_v18  ;;  %1359 = vmatprep.subr.bf16.mxu1 %v1860_v15 }
 0x24f   :  { %v766_v26 = vmax.bf16 %v2012_v1, %v750_v20 }
 0x250   :  { %v705_v22 = vpop.f32.mrb[16].mxu1  ;;  %v767_v23 = vmax.bf16 %v2012_v1, %v751_v21 }
 0x251   :  { %v707_v24 = vpop.f32.mrb[17].mxu1  ;;  %v706_v31 = vadd.f32 %v705_v22, %v2223_v39 }
 0x252   :  { %v709_v29 = vpop.f32.mrb[18].mxu1  ;;  %1042 = vmatprep.mubr.bf16.mxu0 %v767_v23  ;;  %v708_v34 = vadd.f32 %v707_v24, %v2226_v41 }
 0x253   :  { %v710_v32 = vadd.f32 %v709_v29, %v2223_v39  ;;  %v711_v33 = vpop.f32.mrb[19].mxu1  ;;  %1043 = vmatmul.mubr.bf16.gmra.mrb[44].mxu0 %v766_v26 }
 0x254   :  { %v712_v35 = vadd.f32 %v711_v33, %v2226_v41 }
 0x255   :  { %v752_v36 = vpack.c.bf16 %v710_v32, %v706_v31 }
 0x256   :  { %v753_v37 = vpack.c.bf16 %v712_v35, %v708_v34 }
 0x257   :  { %v768_v43 = vmax.bf16 %v2012_v1, %v752_v36 }
 0x258   :  { %v715_v38 = vpop.f32.mrb[20].mxu1  ;;  %v769_v40 = vmax.bf16 %v2012_v1, %v753_v37 }
 0x259   :  { %v717_v42 = vpop.f32.mrb[21].mxu1  ;;  %v716_v45 = vadd.f32 %v715_v38, %v2223_v39 }
 0x25a   :  { %v719_v44 = vpop.f32.mrb[22].mxu1  ;;  %1052 = vmatprep.mubr.bf16.mxu0 %v769_v40  ;;  %v718_v48 = vadd.f32 %v717_v42, %v2226_v41 }
 0x25b   :  { %v720_v46 = vadd.f32 %v719_v44, %v2223_v39  ;;  %v721_v47 = vpop.f32.mrb[23].mxu1  ;;  %1053 = vmatmul.mubr.bf16.gmra.mrb[48].mxu0 %v768_v43 }
 0x25c   :  { %v722_v49 = vadd.f32 %v721_v47, %v2226_v41 }
 0x25d   :  { %v754_v50 = vpack.c.bf16 %v720_v46, %v716_v45 }
 0x25e   :  { %v755_v51 = vpack.c.bf16 %v722_v49, %v718_v48 }
 0x25f   :  { %v770_v55 = vmax.bf16 %v2012_v1, %v754_v50 }
 0x260   :  { %v725_v52 = vpop.f32.mrb[24].mxu1  ;;  %v771_v53 = vmax.bf16 %v2012_v1, %v755_v51 }
 0x261   :  { %v727_v54 = vpop.f32.mrb[25].mxu1  ;;  %v726_v57 = vadd.f32 %v725_v52, %v2223_v39 }
 0x262   :  { %v729_v56 = vpop.f32.mrb[26].mxu1  ;;  %1062 = vmatprep.mubr.bf16.mxu0 %v771_v53  ;;  %v728_v60 = vadd.f32 %v727_v54, %v2226_v41 }
 0x263   :  { %v730_v58 = vadd.f32 %v729_v56, %v2223_v39  ;;  %v731_v59 = vpop.f32.mrb[27].mxu1  ;;  %1063 = vmatmul.mubr.bf16.gmra.mrb[52].mxu0 %v770_v55 }
 0x264   :  { %v732_v61 = vadd.f32 %v731_v59, %v2226_v41 }
 0x265   :  { %v756_v62 = vpack.c.bf16 %v730_v58, %v726_v57 }
 0x266   :  { %v757_v63 = vpack.c.bf16 %v732_v61, %v728_v60 }
 0x267   :  { %v772_v4 = vmax.bf16 %v2012_v1, %v756_v62 }
 0x268   :  { %v735_v0 = vpop.f32.mrb[28].mxu1  ;;  %v773_v2 = vmax.bf16 %v2012_v1, %v757_v63 }
 0x269   :  { %v737_v3 = vpop.f32.mrb[29].mxu1  ;;  %v736_v6 = vadd.f32 %v735_v0, %v2223_v39 }
 0x26a   :  { %v739_v5 = vpop.f32.mrb[30].mxu1  ;;  %1072 = vmatprep.mubr.bf16.mxu0 %v773_v2  ;;  %v738_v8 = vadd.f32 %v737_v3, %v2226_v41 }
 0x26b   :  { %v740_v28 = vadd.f32 %v739_v5, %v2223_v39  ;;  %v741_v7 = vpop.f32.mrb[31].mxu1  ;;  %1073 = vmatmul.mubr.bf16.gmra.mrb[56].mxu0 %v772_v4  ;;  %v1858_v39 = vld [vmem:[#allocation11 + $0xf0] ss:$8 sps:$4 sm:$0xff]  }
 0x26c   :  { %v742_v9 = vadd.f32 %v741_v7, %v2226_v41  ;;  %1360 = vmatpush1.bf16.msra.mxu1 %v1858_v39  ;;  %v808_v41 = vld [vmem:[%s2417_s6] sm:$0x3] }
 0x26d   :  { %v758_v30 = vpack.c.bf16 %v740_v28, %v736_v6  ;;  %v2280_v16 = vrot.slane %v808_v41, %v2158_v25  ;;  %v2283_v18 = vrot.slane %v808_v41, %v2163_v27 }
 0x26e   :  { %v759_v10 = vpack.c.bf16 %v742_v9, %v738_v8 }
 0x26f   :  { %v774_v12 = vmax.bf16 %v2012_v1, %v758_v30 }
 0x270   :  { %v775_v11 = vmax.bf16 %v2012_v1, %v759_v10 }
 0x272   :  { %1082 = vmatprep.mubr.bf16.mxu0 %v775_v11 }
 0x273   :  { %1083 = vmatmul.mubr.bf16.gmra.mrb[60].mxu0 %v774_v12 }
 0x30e   :  { %v1014_v17 = vpop.f32.mrb[32].mxu0 }
 0x30f   :  { %v1016_v19 = vpop.f32.mrb[33].mxu0  ;;  %v1015_v21 = vadd.f32 %v1014_v17, %v2280_v16 }
 0x310   :  { %v1018_v20 = vpop.f32.mrb[34].mxu0  ;;  %v1017_v24 = vadd.f32 %v1016_v19, %v2283_v18 }
 0x311   :  { %v1019_v22 = vadd.f32 %v1018_v20, %v2280_v16  ;;  %v1020_v23 = vpop.f32.mrb[35].mxu0 }
 0x312   :  { %v1021_v26 = vadd.f32 %v1020_v23, %v2283_v18 }
 0x313   :  { %v1093_v29 = vpack.c.bf16 %v1019_v22, %v1015_v21 }
 0x314   :  { %v1094_v31 = vpack.c.bf16 %v1021_v26, %v1017_v24 }
 0x315   :  { %v1109_v34 = vmax.bf16 %v2012_v1, %v1093_v29 }
 0x316   :  { %v1024_v32 = vpop.f32.mrb[36].mxu0  ;;  %v1110_v33 = vmax.bf16 %v2012_v1, %v1094_v31 }
 0x317   :  { %v1026_v35 = vpop.f32.mrb[37].mxu0  ;;  %v1025_v37 = vadd.f32 %v1024_v32, %v2280_v16 }
 0x318   :  { %v1028_v36 = vpop.f32.mrb[38].mxu0  ;;  %1361 = vmatprep.mubr.bf16.mxu1 %v1110_v33  ;;  %v1027_v42 = vadd.f32 %v1026_v35, %v2283_v18 }
 0x319   :  { %v1029_v38 = vadd.f32 %v1028_v36, %v2280_v16  ;;  %v1030_v40 = vpop.f32.mrb[39].mxu0  ;;  %1362 = vmatmul.mubr.bf16.vlgmr.msra.gmra.mrb[32].mxu1 %v1109_v34 }
 0x31a   :  { %v1031_v43 = vadd.f32 %v1030_v40, %v2283_v18 }
 0x31b   :  { %v1095_v44 = vpack.c.bf16 %v1029_v38, %v1025_v37 }
 0x31c   :  { %v1096_v45 = vpack.c.bf16 %v1031_v43, %v1027_v42 }
 0x31d   :  { %v1111_v49 = vmax.bf16 %v2012_v1, %v1095_v44 }
 0x31e   :  { %v1034_v46 = vpop.f32.mrb[40].mxu0  ;;  %v1112_v47 = vmax.bf16 %v2012_v1, %v1096_v45 }
 0x31f   :  { %v1036_v48 = vpop.f32.mrb[41].mxu0  ;;  %v1035_v51 = vadd.f32 %v1034_v46, %v2280_v16 }
 0x320   :  { %v1038_v50 = vpop.f32.mrb[42].mxu0  ;;  %1371 = vmatprep.mubr.bf16.mxu1 %v1112_v47  ;;  %v1037_v54 = vadd.f32 %v1036_v48, %v2283_v18 }
 0x321   :  { %v1039_v52 = vadd.f32 %v1038_v50, %v2280_v16  ;;  %v1040_v53 = vpop.f32.mrb[43].mxu0  ;;  %1372 = vmatmul.mubr.bf16.gmra.mrb[36].mxu1 %v1111_v49 }
 0x322   :  { %v1041_v55 = vadd.f32 %v1040_v53, %v2283_v18 }
 0x323   :  { %v1097_v56 = vpack.c.bf16 %v1039_v52, %v1035_v51 }
 0x324   :  { %v1098_v57 = vpack.c.bf16 %v1041_v55, %v1037_v54 }
 0x325   :  { %v1113_v61 = vmax.bf16 %v2012_v1, %v1097_v56 }
 0x326   :  { %v1044_v58 = vpop.f32.mrb[44].mxu0  ;;  %v1114_v59 = vmax.bf16 %v2012_v1, %v1098_v57 }
 0x327   :  { %v1046_v60 = vpop.f32.mrb[45].mxu0  ;;  %v1045_v63 = vadd.f32 %v1044_v58, %v2280_v16 }
 0x328   :  { %v1048_v62 = vpop.f32.mrb[46].mxu0  ;;  %1381 = vmatprep.mubr.bf16.mxu1 %v1114_v59  ;;  %v1047_v3 = vadd.f32 %v1046_v60, %v2283_v18 }
 0x329   :  { %v1049_v0 = vadd.f32 %v1048_v62, %v2280_v16  ;;  %v1050_v2 = vpop.f32.mrb[47].mxu0  ;;  %1382 = vmatmul.mubr.bf16.gmra.mrb[40].mxu1 %v1113_v61  ;;  %v2336_v61 = vld [vmem:[%s2420_s9] sm:$0xff] }
 0x32a   :  { %v1051_v4 = vadd.f32 %v1050_v2, %v2283_v18  ;;  %v1670_v62 = vld [vmem:[#allocation2] ss:$0 sm:$0xff] }
 0x32b   :  { %v1099_v5 = vpack.c.bf16 %v1049_v0, %v1045_v63  ;;  %1482 = vperm.xlu0 %1684, %v1670_v62  }
 0x32c   :  { %v1100_v6 = vpack.c.bf16 %v1051_v4, %v1047_v3 }
 0x32d   :  { %v1115_v9 = vmax.bf16 %v2012_v1, %v1099_v5 }
 0x32e   :  { %v1054_v28 = vpop.f32.mrb[48].mxu0  ;;  %v1116_v7 = vmax.bf16 %v2012_v1, %v1100_v6 }
 0x32f   :  { %v1056_v8 = vpop.f32.mrb[49].mxu0  ;;  %v1055_v10 = vadd.f32 %v1054_v28, %v2280_v16 }
 0x330   :  { %v1058_v30 = vpop.f32.mrb[50].mxu0  ;;  %1391 = vmatprep.mubr.bf16.mxu1 %v1116_v7  ;;  %v1057_v13 = vadd.f32 %v1056_v8, %v2283_v18 }
 0x331   :  { %v1059_v11 = vadd.f32 %v1058_v30, %v2280_v16  ;;  %v1060_v12 = vpop.f32.mrb[51].mxu0  ;;  %1392 = vmatmul.mubr.bf16.gmra.mrb[44].mxu1 %v1115_v9 }
 0x332   :  { %v1061_v14 = vadd.f32 %v1060_v12, %v2283_v18 }
 0x333   :  { %v1101_v15 = vpack.c.bf16 %v1059_v11, %v1055_v10 }
 0x334   :  { %v1102_v39 = vpack.c.bf16 %v1061_v14, %v1057_v13 }
 0x335   :  { %v1117_v20 = vmax.bf16 %v2012_v1, %v1101_v15 }
 0x336   :  { %v1064_v41 = vpop.f32.mrb[52].mxu0  ;;  %v1118_v17 = vmax.bf16 %v2012_v1, %v1102_v39 }
 0x337   :  { %v1066_v19 = vpop.f32.mrb[53].mxu0  ;;  %v1065_v22 = vadd.f32 %v1064_v41, %v2280_v16 }
 0x338   :  { %v1068_v21 = vpop.f32.mrb[54].mxu0  ;;  %1401 = vmatprep.mubr.bf16.mxu1 %v1118_v17  ;;  %v1067_v26 = vadd.f32 %v1066_v19, %v2283_v18 }
 0x339   :  { %v1069_v23 = vadd.f32 %v1068_v21, %v2280_v16  ;;  %v1070_v24 = vpop.f32.mrb[55].mxu0  ;;  %1402 = vmatmul.mubr.bf16.gmra.mrb[48].mxu1 %v1117_v20 }
 0x33a   :  { %v1071_v29 = vadd.f32 %v1070_v24, %v2283_v18 }
 0x33b   :  { %v1103_v31 = vpack.c.bf16 %v1069_v23, %v1065_v22 }
 0x33c   :  { %v1104_v32 = vpack.c.bf16 %v1071_v29, %v1067_v26 }
 0x33d   :  { %v1119_v36 = vmax.bf16 %v2012_v1, %v1103_v31 }
 0x33e   :  { %v1074_v33 = vpop.f32.mrb[56].mxu0  ;;  %v1120_v34 = vmax.bf16 %v2012_v1, %v1104_v32 }
 0x33f   :  { %v1076_v35 = vpop.f32.mrb[57].mxu0  ;;  %v1075_v38 = vadd.f32 %v1074_v33, %v2280_v16 }
 0x340   :  { %v1078_v37 = vpop.f32.mrb[58].mxu0  ;;  %1411 = vmatprep.mubr.bf16.mxu1 %v1120_v34  ;;  %v1077_v43 = vadd.f32 %v1076_v35, %v2283_v18 }
 0x341   :  { %v1079_v40 = vadd.f32 %v1078_v37, %v2280_v16  ;;  %v1080_v42 = vpop.f32.mrb[59].mxu0  ;;  %1412 = vmatmul.mubr.bf16.gmra.mrb[52].mxu1 %v1119_v36 }
 0x342   :  { %v1081_v44 = vadd.f32 %v1080_v42, %v2283_v18 }
 0x343   :  { %v1105_v45 = vpack.c.bf16 %v1079_v40, %v1075_v38 }
 0x344   :  { %v1106_v46 = vpack.c.bf16 %v1081_v44, %v1077_v43 }
 0x345   :  { %v1121_v50 = vmax.bf16 %v2012_v1, %v1105_v45 }
 0x346   :  { %v1084_v47 = vpop.f32.mrb[60].mxu0  ;;  %v1122_v48 = vmax.bf16 %v2012_v1, %v1106_v46 }
 0x347   :  { %v1086_v49 = vpop.f32.mrb[61].mxu0  ;;  %v1085_v52 = vadd.f32 %v1084_v47, %v2280_v16 }
 0x348   :  { %v1088_v51 = vpop.f32.mrb[62].mxu0  ;;  %1421 = vmatprep.mubr.bf16.mxu1 %v1122_v48  ;;  %v1087_v55 = vadd.f32 %v1086_v49, %v2283_v18 }
 0x349   :  { %v1089_v53 = vadd.f32 %v1088_v51, %v2280_v16  ;;  %v1090_v54 = vpop.f32.mrb[63].mxu0  ;;  %1422 = vmatmul.mubr.bf16.gmra.mrb[56].mxu1 %v1121_v50  ;;  %v1672_v16 = vcombine.high %v2336_v61, %v2336_v61 }
 0x34a   :  { %v1091_v56 = vadd.f32 %v1090_v54, %v2283_v18  ;;  %v1157_v18 = vld [vmem:[%s2419_s8] sm:$0x3]  ;;  %s2013_s8 = smov [#allocation12]  }
 0x34b   :  { %v1107_v57 = vpack.c.bf16 %v1089_v53, %v1085_v52  ;;  %1524 = vmatprep.mubr.bf16.mxu0 %v1672_v16  ;;  %v2344_v63 = vrot.slane %v1157_v18, %v2158_v25  ;;  %v2347_v2 = vrot.slane %v1157_v18, %v2163_v27  ;;  %s1539_s9 = sshll.u32 %s2013_s8, 4  ;;  %s1540_s9 = int_to_ptr.vmem [resolvable:$true] %s1539_s9 }
 0x34c   :  { %v1108_v58 = vpack.c.bf16 %v1091_v56, %v1087_v55  ;;  %s1973_s25 = scalar_lea.vmem %s1540_s9, 16  ;;  %s1977_s26 = scalar_lea.vmem %s1540_s9, 32 }
 0x34d   :  { %v1123_v60 = vmax.bf16 %v2012_v1, %v1107_v57  ;;  %p1974_p12 = scmp.ne.s32.totalorder %s1540_s9, %s1973_s25  ;;  %p1978_p13 = scmp.lt.s32.totalorder %s1540_s9, %s1540_s9 }
 0x34e   :  { %v1124_v59 = vmax.bf16 %v2012_v1, %v1108_v58  ;;  %p1979_p0 = scmp.lt.s32.totalorder %s1977_s26, %s1973_s25 }
 0x350   :  { %1431 = vmatprep.mubr.bf16.mxu1 %v1124_v59  ;;  %p1980_p1 = por %p1979_p0, %p1978_p13 }
 0x351   :  { %1432 = vmatmul.mubr.bf16.gmra.mrb[60].mxu1 %v1123_v60 }
 0x352   :  { %p1981_p2 = pnand %p1980_p1, %p1974_p12 }
 0x3ec   :  { %v1363_v0 = vpop.f32.mrb[32].mxu1 }
 0x3ed   :  { %v1365_v3 = vpop.f32.mrb[33].mxu1  ;;  %v1364_v5 = vadd.f32 %v1363_v0, %v2344_v63 }
 0x3ee   :  { %v1367_v4 = vpop.f32.mrb[34].mxu1  ;;  %v1366_v7 = vadd.f32 %v1365_v3, %v2347_v2 }
 0x3ef   :  { %v1368_v6 = vadd.f32 %v1367_v4, %v2344_v63  ;;  %v1369_v28 = vpop.f32.mrb[35].mxu1 }
 0x3f0   :  { %v1370_v8 = vadd.f32 %v1369_v28, %v2347_v2 }
 0x3f1   :  { %v1442_v9 = vpack.c.bf16 %v1368_v6, %v1364_v5 }
 0x3f2   :  { %v1443_v30 = vpack.c.bf16 %v1370_v8, %v1366_v7 }
 0x3f3   :  { %v1458_v11 = vmax.bf16 %v2012_v1, %v1442_v9 }
 0x3f4   :  { %v1373_v10 = vpop.f32.mrb[36].mxu1  ;;  %v1459_v25 = vmax.bf16 %v2012_v1, %v1443_v30 }
 0x3f5   :  { %v1375_v27 = vpop.f32.mrb[37].mxu1  ;;  %v1374_v13 = vadd.f32 %v1373_v10, %v2344_v63 }
 0x3f6   :  { %v1377_v12 = vpop.f32.mrb[38].mxu1  ;;  %1492 = vmatprep.subr.bf16.mxu0 %v1459_v25  ;;  %v1376_v39 = vadd.f32 %v1375_v27, %v2347_v2 }
 0x3f7   :  { %v1378_v14 = vadd.f32 %v1377_v12, %v2344_v63  ;;  %v1379_v15 = vpop.f32.mrb[39].mxu1  ;;  %1493 = vmatpush1.bf16.xpose.msra.mxu0 %v1458_v11 }
 0x3f8   :  { %v1380_v41 = vadd.f32 %v1379_v15, %v2347_v2 }
 0x3f9   :  { %v1444_v17 = vpack.c.bf16 %v1378_v14, %v1374_v13 }
 0x3fa   :  { %v1445_v19 = vpack.c.bf16 %v1380_v41, %v1376_v39 }
 0x3fb   :  { %v1460_v22 = vmax.bf16 %v2012_v1, %v1444_v17 }
 0x3fc   :  { %v1383_v20 = vpop.f32.mrb[40].mxu1  ;;  %v1461_v21 = vmax.bf16 %v2012_v1, %v1445_v19 }
 0x3fd   :  { %v1385_v23 = vpop.f32.mrb[41].mxu1  ;;  %v1384_v26 = vadd.f32 %v1383_v20, %v2344_v63 }
 0x3fe   :  { %v1387_v24 = vpop.f32.mrb[42].mxu1  ;;  %1494 = vmatprep.subr.bf16.mxu0 %v1461_v21  ;;  %v1386_v32 = vadd.f32 %v1385_v23, %v2347_v2 }
 0x3ff   :  { %v1388_v29 = vadd.f32 %v1387_v24, %v2344_v63  ;;  %v1389_v31 = vpop.f32.mrb[43].mxu1  ;;  %1495 = vmatpush1.bf16.xpose.msra.mxu0 %v1460_v22 }
 0x400   :  { %v1390_v33 = vadd.f32 %v1389_v31, %v2347_v2 }
 0x401   :  { %v1446_v34 = vpack.c.bf16 %v1388_v29, %v1384_v26 }
 0x402   :  { %v1447_v35 = vpack.c.bf16 %v1390_v33, %v1386_v32 }
 0x403   :  { %v1462_v38 = vmax.bf16 %v2012_v1, %v1446_v34 }
 0x404   :  { %v1393_v36 = vpop.f32.mrb[44].mxu1  ;;  %v1463_v37 = vmax.bf16 %v2012_v1, %v1447_v35 }
 0x405   :  { %v1395_v40 = vpop.f32.mrb[45].mxu1  ;;  %v1394_v43 = vadd.f32 %v1393_v36, %v2344_v63 }
 0x406   :  { %v1397_v42 = vpop.f32.mrb[46].mxu1  ;;  %1496 = vmatprep.subr.bf16.mxu0 %v1463_v37  ;;  %v1396_v46 = vadd.f32 %v1395_v40, %v2347_v2  ;;  %v1483_v40 = vpop.permute.xlu0 %1482 }
 0x407   :  { %v1398_v44 = vadd.f32 %v1397_v42, %v2344_v63  ;;  %v1399_v45 = vpop.f32.mrb[47].mxu1  ;;  %1497 = vmatpush1.bf16.xpose.msra.mxu0 %v1462_v38  ;;  %v1671_v38 = vcombine.low %v2336_v61, %v2336_v61 }
 0x408   :  { %v1400_v47 = vadd.f32 %v1399_v45, %v2347_v2 }
 0x409   :  { %v1448_v48 = vpack.c.bf16 %v1398_v44, %v1394_v43 }
 0x40a   :  { %v1449_v49 = vpack.c.bf16 %v1400_v47, %v1396_v46 }
 0x40b   :  { %v1464_v52 = vmax.bf16 %v2012_v1, %v1448_v48 }
 0x40c   :  { %v1403_v50 = vpop.f32.mrb[48].mxu1  ;;  %v1465_v51 = vmax.bf16 %v2012_v1, %v1449_v49 }
 0x40d   :  { %v1405_v53 = vpop.f32.mrb[49].mxu1  ;;  %v1404_v55 = vadd.f32 %v1403_v50, %v2344_v63 }
 0x40e   :  { %v1407_v54 = vpop.f32.mrb[50].mxu1  ;;  %1498 = vmatprep.subr.bf16.mxu0 %v1465_v51  ;;  %v1406_v58 = vadd.f32 %v1405_v53, %v2347_v2 }
 0x40f   :  { %v1408_v56 = vadd.f32 %v1407_v54, %v2344_v63  ;;  %v1409_v57 = vpop.f32.mrb[51].mxu1  ;;  %1499 = vmatpush1.bf16.xpose.msra.mxu0 %v1464_v52 }
 0x410   :  { %v1410_v59 = vadd.f32 %v1409_v57, %v2347_v2 }
 0x411   :  { %v1450_v60 = vpack.c.bf16 %v1408_v56, %v1404_v55 }
 0x412   :  { %v1451_v16 = vpack.c.bf16 %v1410_v59, %v1406_v58 }
 0x413   :  { %v1466_v0 = vmax.bf16 %v2012_v1, %v1450_v60 }
 0x414   :  { %v1413_v62 = vpop.f32.mrb[52].mxu1  ;;  %v1467_v18 = vmax.bf16 %v2012_v1, %v1451_v16 }
 0x415   :  { %v1415_v3 = vpop.f32.mrb[53].mxu1  ;;  %v1414_v5 = vadd.f32 %v1413_v62, %v2344_v63 }
 0x416   :  { %v1417_v4 = vpop.f32.mrb[54].mxu1  ;;  %1500 = vmatprep.subr.bf16.mxu0 %v1467_v18  ;;  %v1416_v7 = vadd.f32 %v1415_v3, %v2347_v2 }
 0x417   :  { %v1418_v6 = vadd.f32 %v1417_v4, %v2344_v63  ;;  %v1419_v28 = vpop.f32.mrb[55].mxu1  ;;  %1501 = vmatpush1.bf16.xpose.msra.mxu0 %v1466_v0 }
 0x418   :  { %v1420_v8 = vadd.f32 %v1419_v28, %v2347_v2 }
 0x419   :  { %v1452_v9 = vpack.c.bf16 %v1418_v6, %v1414_v5 }
 0x41a   :  { %v1453_v30 = vpack.c.bf16 %v1420_v8, %v1416_v7 }
 0x41b   :  { %v1468_v11 = vmax.bf16 %v2012_v1, %v1452_v9 }
 0x41c   :  { %v1423_v10 = vpop.f32.mrb[56].mxu1  ;;  %v1469_v25 = vmax.bf16 %v2012_v1, %v1453_v30 }
 0x41d   :  { %v1425_v27 = vpop.f32.mrb[57].mxu1  ;;  %v1424_v13 = vadd.f32 %v1423_v10, %v2344_v63 }
 0x41e   :  { %v1427_v12 = vpop.f32.mrb[58].mxu1  ;;  %1502 = vmatprep.subr.bf16.mxu0 %v1469_v25  ;;  %v1426_v39 = vadd.f32 %v1425_v27, %v2347_v2 }
 0x41f   :  { %v1428_v14 = vadd.f32 %v1427_v12, %v2344_v63  ;;  %v1429_v15 = vpop.f32.mrb[59].mxu1  ;;  %1503 = vmatpush1.bf16.xpose.msra.mxu0 %v1468_v11 }
 0x420   :  { %v1430_v41 = vadd.f32 %v1429_v15, %v2347_v2 }
 0x421   :  { %v1454_v17 = vpack.c.bf16 %v1428_v14, %v1424_v13 }
 0x422   :  { %v1455_v19 = vpack.c.bf16 %v1430_v41, %v1426_v39 }
 0x423   :  { %v1470_v22 = vmax.bf16 %v2012_v1, %v1454_v17 }
 0x424   :  { %v1433_v20 = vpop.f32.mrb[60].mxu1  ;;  %v1471_v21 = vmax.bf16 %v2012_v1, %v1455_v19 }
 0x425   :  { %v1435_v23 = vpop.f32.mrb[61].mxu1  ;;  %v1434_v26 = vadd.f32 %v1433_v20, %v2344_v63 }
 0x426   :  { %v1437_v24 = vpop.f32.mrb[62].mxu1  ;;  %1504 = vmatprep.subr.bf16.mxu0 %v1471_v21  ;;  %v1436_v32 = vadd.f32 %v1435_v23, %v2347_v2 }
 0x427   :  { %v1438_v29 = vadd.f32 %v1437_v24, %v2344_v63  ;;  %v1439_v31 = vpop.f32.mrb[63].mxu1  ;;  %1505 = vmatpush1.bf16.xpose.msra.mxu0 %v1470_v22 }
 0x428   :  { %v1440_v33 = vadd.f32 %v1439_v31, %v2347_v2 }
 0x429   :  { %v1456_v34 = vpack.c.bf16 %v1438_v29, %v1434_v26 }
 0x42a   :  { %v1457_v35 = vpack.c.bf16 %v1440_v33, %v1436_v32 }
 0x42b   :  { %v1472_v37 = vmax.bf16 %v2012_v1, %v1456_v34 }
 0x42c   :  { %v1473_v36 = vmax.bf16 %v2012_v1, %v1457_v35 }
 0x42e   :  { %1506 = vmatprep.subr.bf16.mxu0 %v1473_v36 }
 0x42f   :  { %1507 = vmatpush1.bf16.xpose.msra.mxu0 %v1472_v37 }
 0x436   :  { %1525 = vmatmul.mubr.bf16.vlgmr.msra.gmra.mrb[64].mxu0 %v1671_v38 }
 0x509   :  { %v1526_v63 = vpop.f32.mrb[64].mxu0 }
 0x50a   :  { %v1527_v42 = vadd.f32 %v1526_v63, %v1483_v40  ;;  %v1528_v43 = vpop.f32.mrb[65].mxu0 }
 0x50b   :  { %v1529_v2 = vpop.f32.mrb[66].mxu0 }
 0x50c   :  { %1532 = vst [vmem:[#allocation12] sm:$0x1] %v1527_v42  ;;  %v1530_v44 = vpop.f32.mrb[67].mxu0 }
 0x50d   :  { %1984 = shalt.err (!%p1981_p2)
}
 0x50e   :  { %s1985_s30 = scalar_lea.hbm %s2422_s11, 16 }
 0x50f   :  { %p1986_p3 = scmp.ne.s32.totalorder %s2422_s11, %s1985_s30  ;;  %p1989_p4 = scmp.lt.u32.totalorder %s1985_s30, %s2422_s11 }
 0x511   :  { %p1991_p5 = pnand %p1989_p4, %p1986_p3 }
 0x513   :  { %1994 = shalt.err (!%p1991_p5)
}
 0x514   :  { %1542 = dma.vmem_to_hbm [thread:$0]  %s1540_s9, 16, %s2422_s11, [#allocation5]  }
 0x515   :  { %2001 = dma.done.wait [#allocation5], 16  }
 0x516   :  { %2002 = vsyncadd [#allocation5], 4294967280 }
 0x517   :  { %1546 = vsyncpa [#allocation4], 1 }
 0x518   :  { %1547 = vsyncpa [#allocation7], 1 }
 0x519   :  { %1548 = vsyncpa [#allocation10], 1 }
 0x51a   :  { %1549 = vsyncpa [#allocation5], 1 }

</bundles_post_ra>
